<compile_context>
chip_gen: v6e
topology: v6e:2x2x1
jax: 0.10.0
libtpu: 0.0.40
codegen_flags: <defaults>
</compile_context>

<pallas_src>
import functools

import jax
import jax.numpy as jnp
from jax.experimental import pallas as pl
from jax.experimental.pallas import tpu as pltpu


# --------------------------------------------------------------------------- kernel

def _transformer_layer_kernel(
    x_ref, mrow_ref, mcol_ref,
    wqkv_ref, bqkv_ref, wo_ref, bo_ref, ga_ref, ba_ref,
    w1_ref, b1_ref, w2_ref, b2_ref, gf_ref, bf_ref,
    out_ref,
    *, num_heads, head_size, seq_len, batch_block, compute_dtype,
):
    nh, D, L, bt = num_heads, head_size, seq_len, batch_block
    T = bt * L                           # rows per grid step, ordered (batch, position)
    HD = nh * D
    H = x_ref.shape[-1]
    cdt = compute_dtype
    f32 = jnp.float32
    scale = f32(1.0 / (D ** 0.5))
    use_approx = cdt != jnp.float32      # approx reciprocal only in the low-precision mode

    x = x_ref[...].reshape(T, H)         # f32 activations (kept f32 for residual/norm)
    mrow = mrow_ref[...]                 # (bt, 1, L) key mask, 1 = keep / 0 = pad
    qmask = mcol_ref[...].reshape(T, 1)  # (T, 1)     query mask

    # ---- fused QKV projection: one wide MXU call (T,H) @ (H, 3*nh*D) ----------------
    xc = x.astype(cdt)
    qkv = jnp.dot(xc, wqkv_ref[...], preferred_element_type=f32).astype(cdt) + bqkv_ref[...]
    q = qkv[:, 0 * HD:1 * HD]            # (T, nh*D), compute_dtype end-to-end
    k = qkv[:, 1 * HD:2 * HD]
    v = qkv[:, 2 * HD:3 * HD]

    def to_heads(t):                     # (T, nh*D) -> (bt*nh, L, D)  (PyTorch permute)
        return (t.reshape(bt, L, nh, D)
                 .transpose(0, 2, 1, 3)
                 .reshape(bt * nh, L, D))

    qh, kh, vh = to_heads(q), to_heads(k), to_heads(v)

    # ---- scores + masked softmax (f32) -----------------------------------------------
    s = jnp.einsum("bqd,bkd->bqk", qh, kh, preferred_element_type=f32) * scale
    # Additive key-padding bias (0 keep / -1e30 pad): identical softmax weights to
    # masked_fill(-inf) for any row with >=1 valid key, no NaN otherwise.
    key_bias = (mrow - 1.0) * f32(1e30)                                  # (bt, 1, L)
    key_bias = jnp.broadcast_to(key_bias[:, None], (bt, nh, 1, L)).reshape(bt * nh, 1, L)
    s = s + key_bias
    m = jnp.max(s, axis=-1, keepdims=True)
    e = jnp.exp(s - m)
    denom = jnp.sum(e, axis=-1, keepdims=True)
    p = e * pl.reciprocal(denom, approx=use_approx)                      # (bt*nh, L, L)

    # ---- context + fused output projection -------------------------------------------
    ctx = jnp.einsum("bqk,bkd->bqd", p.astype(cdt), vh, preferred_element_type=f32)
    ctx = (ctx.astype(cdt)
              .reshape(bt, nh, L, D)
              .transpose(0, 2, 1, 3)     # back to (batch, pos, head, d) like the reference
              .reshape(T, HD))
    proj = jnp.dot(ctx, wo_ref[...], preferred_element_type=f32)         # (T, H)
    # Query-mask row scaling commutes with the Wo right-multiplication; bias added after,
    # exactly as in the reference (weights * query_mask, then wo(...) + bo).
    attn_out = proj * qmask + bo_ref[...]

    def residual_norm(inp2d, out2d, g_ref, b_ref):
        # residual + normalization over the SEQUENCE axis (torch dim=1), std ddof=1.
        xr = (inp2d + out2d).reshape(bt, L, H)
        mean = jnp.mean(xr, axis=1, keepdims=True)
        var = jnp.sum((xr - mean) ** 2, axis=1, keepdims=True) / (L - 1)
        return (xr - mean) / jnp.sqrt(var) * g_ref[...] + b_ref[...]     # (bt, L, H)

    attn_norm = residual_norm(x, attn_out, ga_ref, ba_ref)
    a2 = attn_norm.reshape(T, H)

    # ---- FFN: (T,I) intermediate kept in compute_dtype (bias + ReLU in cdt) ----------
    h1 = jnp.dot(a2.astype(cdt), w1_ref[...], preferred_element_type=f32).astype(cdt) \
        + b1_ref[...]
    h1 = jnp.maximum(h1, 0.0)
    ffn = jnp.dot(h1, w2_ref[...], preferred_element_type=f32) + b2_ref[...]

    result = residual_norm(a2, ffn, gf_ref, bf_ref)                      # (bt, L, H)
    # Lane-dense store when the wrapper flattened the output block (H % 128 != 0).
    out_ref[...] = result.reshape(out_ref.shape)


# --------------------------------------------------------------------------- helpers

def _choose_batch_block(batch, seq_len, per_batch_bytes, *,
                        target_rows=256, vmem_budget=24 << 20,
                        keep_two_steps=False):
    """Fold batch elements per grid step.

    Bigger blocks amortize the ~0.35us/step overhead; on single-TensorCore chips
    (v5e/v6e) the grid is a serial loop, so fold as much as the VMEM budget allows.
    Pass keep_two_steps=True on v7x so the 'parallel' batch axis can be sharded
    across its two TensorCores.
    """
    row_cap = max(target_rows, seq_len)
    best = 1
    for cand in range(1, batch + 1):
        if batch % cand:
            continue
        if cand * seq_len > row_cap:
            continue
        if cand * per_batch_bytes > vmem_budget:
            continue
        if keep_two_steps and batch >= 2 and batch // cand < 2:
            continue
        best = cand
    return best


def _vmem_limit_bytes(estimated_need_bytes):
    """Explicit scoped-VMEM budget when the default (16/32 MiB) would be too small."""
    default_scoped = 32 << 20
    if estimated_need_bytes <= default_scoped // 2:
        return None                       # default scoped limit is plenty
    try:
        cap = int(pltpu.get_tpu_info().vmem_capacity_bytes)
    except Exception:                      # conservative fallback (v7x physical = 64 MiB)
        cap = 64 << 20
    return int(min(max(estimated_need_bytes * 5 // 4, default_scoped), cap * 9 // 10))


# --------------------------------------------------------------------------- wrapper

def transformer_layer(x, mask, params, *, num_heads, head_size,
                      compute_dtype=jnp.bfloat16, batch_block=None,
                      keep_two_grid_steps=False):
    B, L, H = x.shape
    nh, D = num_heads, head_size
    HD = nh * D
    I = params["w1"].shape[1]
    cdt = compute_dtype
    itemsize = jnp.dtype(cdt).itemsize

    # Masks: (B,1,L) key row-mask and (B,L,1) query column-mask (tiny operands).
    maskf = mask.astype(jnp.float32)
    mask_row = maskf.reshape(B, 1, L)
    mask_col = maskf.reshape(B, L, 1)

    # Fused QKV weights in the ORIGINAL (H, nh*D) layout: one wide matmul in-kernel.
    wqkv = jnp.concatenate([params["wq"], params["wk"], params["wv"]], axis=1).astype(cdt)
    bqkv = jnp.concatenate([params["bq"], params["bk"], params["bv"]]).reshape(1, 3 * HD).astype(cdt)

    row_f32 = lambda v: v.reshape(1, -1).astype(jnp.float32)

    inputs = (
        x.astype(jnp.float32), mask_row, mask_col,
        wqkv, bqkv,
        params["wo"].astype(cdt), row_f32(params["bo"]),
        row_f32(params["g_attn"]), row_f32(params["b_attn"]),
        params["w1"].astype(cdt), params["b1"].reshape(1, -1).astype(cdt),
        params["w2"].astype(cdt), row_f32(params["b2"]),
        row_f32(params["g_ffn"]), row_f32(params["b_ffn"]),
    )

    # Dominant per-batch-element temporaries (scores/exp/probs f32, qkv/h1 in cdt, misc f32).
    per_batch_bytes = (nh * L * L * 4 * 3
                       + L * 3 * HD * itemsize * 2
                       + L * I * itemsize
                       + L * H * 4 * 8)
    bt = (batch_block if batch_block is not None
          else _choose_batch_block(B, L, per_batch_bytes,
                                   keep_two_steps=keep_two_grid_steps))
    assert B % bt == 0

    weight_bytes = sum(int(a.size) * jnp.dtype(a.dtype).itemsize for a in inputs[3:])
    act_bytes = 2 * 2 * bt * L * H * 4           # double-buffered in + out blocks (f32)
    vmem_limit = _vmem_limit_bytes(weight_bytes + act_bytes + bt * per_batch_bytes)

    # Activations & masks are pipelined per (folded) batch block; weights/biases are
    # grid-invariant, single VMEM-resident copies (no per-step DMA / double buffering).
    in_specs = [
        pl.BlockSpec((bt, L, H), lambda b: (b, 0, 0)),
        pl.BlockSpec((bt, 1, L), lambda b: (b, 0, 0)),
        pl.BlockSpec((bt, L, 1), lambda b: (b, 0, 0)),
    ] + [pl.BlockSpec(memory_space=pltpu.MemorySpace.VMEM) for _ in inputs[3:]]

    # Lane-dense output slab when H is not a multiple of 128 (avoids masked vst).
    flatten_out = (H % 128) != 0
    if flatten_out:
        out_shape = jax.ShapeDtypeStruct((B, 1, L * H), jnp.float32)
        out_spec = pl.BlockSpec((bt, 1, L * H), lambda b: (b, 0, 0))
    else:
        out_shape = jax.ShapeDtypeStruct((B, L, H), jnp.float32)
        out_spec = pl.BlockSpec((bt, L, H), lambda b: (b, 0, 0))

    kernel = functools.partial(
        _transformer_layer_kernel,
        num_heads=nh, head_size=D, seq_len=L, batch_block=bt,
        compute_dtype=cdt)

    flops = int(B * L * (2 * H * 3 * HD + 4 * nh * L * D + 2 * HD * H + 4 * H * I))
    cost = pl.CostEstimate(
        flops=flops,
        transcendentals=int(B * nh * L * L),
        bytes_accessed=int(2 * B * L * H * 4 + weight_bytes + B * L * 2 * 4))

    out = pl.pallas_call(
        kernel,
        out_shape=out_shape,
        grid_spec=pltpu.PrefetchScalarGridSpec(
            num_scalar_prefetch=0,
            grid=(B // bt,),
            in_specs=in_specs,
            out_specs=out_spec,
        ),
        compiler_params=pltpu.CompilerParams(
            dimension_semantics=("parallel",),
            vmem_limit_bytes=vmem_limit),
        cost_estimate=cost,
    )(*inputs)

    if flatten_out:
        out = out.reshape(B, L, H)
    return out


# --------------------------------------------------------------------------- reference

def reference_forward(x, mask, params, *, num_heads, head_size):
    """Pure-JAX mirror of the PyTorch module (eval mode, f32)."""
    B, L, H = x.shape
    D = head_size
    scale = 1.0 / (D ** 0.5)

    def lin(a, w, b):
        return a @ w + b

    q = lin(x, params["wq"], params["bq"]).reshape(B, L, num_heads, D).transpose(0, 2, 1, 3)
    k = lin(x, params["wk"], params["bk"]).reshape(B, L, num_heads, D).transpose(0, 2, 1, 3)
    v = lin(x, params["wv"], params["bv"]).reshape(B, L, num_heads, D).transpose(0, 2, 1, 3)
    s = jnp.einsum("bhqd,bhkd->bhqk", q, k) * scale
    s = jnp.where(mask[:, None, None, :] == 0.0, -jnp.inf, s)
    w = jax.nn.softmax(s, axis=-1)
    w = w * mask[:, None, :, None]
    a = jnp.einsum("bhqk,bhkd->bhqd", w, v).transpose(0, 2, 1, 3).reshape(B, L, num_heads * D)
    attn_out = lin(a, params["wo"], params["bo"])

    def norm(inp, outp, g, b):
        xr = inp + outp
        mean = jnp.mean(xr, axis=1, keepdims=True)
        std = jnp.sqrt(jnp.sum((xr - mean) ** 2, axis=1, keepdims=True) / (L - 1))
        return (xr - mean) / std * g + b

    attn_norm = norm(x, attn_out, params["g_attn"], params["b_attn"])
    h1 = jnp.maximum(lin(attn_norm, params["w1"], params["b1"]), 0.0)
    ffn_out = lin(h1, params["w2"], params["b2"])
    return norm(attn_norm, ffn_out, params["g_ffn"], params["b_ffn"])


# --------------------------------------------------------------------------- main

if __name__ == "__main__":
    # Small config consistent with TransformerConfig
    B, L = 4, 8
    hidden_size = 32
    head_size = 8
    num_heads = 4
    intermediate_size = 64
    HD = head_size * num_heads

    key = jax.random.PRNGKey(0)
    keys = jax.random.split(key, 16)

    def init(k, shape):
        return jax.random.normal(k, shape, jnp.float32) * 0.05

    params = {
        "wq": init(keys[0], (hidden_size, HD)), "bq": init(keys[1], (HD,)),
        "wk": init(keys[2], (hidden_size, HD)), "bk": init(keys[3], (HD,)),
        "wv": init(keys[4], (hidden_size, HD)), "bv": init(keys[5], (HD,)),
        "wo": init(keys[6], (HD, hidden_size)), "bo": init(keys[7], (hidden_size,)),
        "g_attn": jnp.ones((hidden_size,), jnp.float32),
        "b_attn": jnp.zeros((hidden_size,), jnp.float32),
        "w1": init(keys[8], (hidden_size, intermediate_size)), "b1": init(keys[9], (intermediate_size,)),
        "w2": init(keys[10], (intermediate_size, hidden_size)), "b2": init(keys[11], (hidden_size,)),
        "g_ffn": jnp.ones((hidden_size,), jnp.float32),
        "b_ffn": jnp.zeros((hidden_size,), jnp.float32),
    }

    x = jax.random.normal(keys[12], (B, L, hidden_size), jnp.float32)
    # attention mask: some sequences partially padded (every sequence keeps valid keys)
    mask = jnp.ones((B, L), jnp.float32)
    mask = mask.at[1, 6:].set(0.0).at[3, 5:].set(0.0)

    ref = reference_forward(x, mask, params, num_heads=num_heads, head_size=head_size)

    # 1) exact-semantics mode (f32 matmuls) — tight agreement with the PyTorch math
    out_f32 = transformer_layer(x, mask, params, num_heads=num_heads,
                                head_size=head_size, compute_dtype=jnp.float32)
    out_f32 = jax.block_until_ready(out_f32)
    if not jnp.allclose(out_f32, ref, rtol=1e-3, atol=1e-3):
        raise AssertionError("f32 Pallas kernel output does not match reference")

    # 2) performance mode (bf16 matmul inputs, f32 accumulation)
    out_bf16 = transformer_layer(x, mask, params, num_heads=num_heads,
                                 head_size=head_size, compute_dtype=jnp.bfloat16)
    out_bf16 = jax.block_until_ready(out_bf16)
    if not jnp.allclose(out_bf16, ref, rtol=5e-2, atol=5e-2):
        raise AssertionError("bf16 Pallas kernel output does not match reference")

    print("KERNEL_OK")
</pallas_src>

<mosaic_0001>
module attributes {stable_mosaic.version = 11 : i64} {
  func.func @_transformer_layer_kernel(%arg0: i32, %arg1: memref<4x8x32xf32, #tpu.memory_space<vmem>>, %arg2: memref<4x1x8xf32, #tpu.memory_space<vmem>>, %arg3: memref<4x8x1xf32, #tpu.memory_space<vmem>>, %arg4: memref<32x96xf32, #tpu.memory_space<vmem>>, %arg5: memref<1x96xf32, #tpu.memory_space<vmem>>, %arg6: memref<32x32xf32, #tpu.memory_space<vmem>>, %arg7: memref<1x32xf32, #tpu.memory_space<vmem>>, %arg8: memref<1x32xf32, #tpu.memory_space<vmem>>, %arg9: memref<1x32xf32, #tpu.memory_space<vmem>>, %arg10: memref<32x64xf32, #tpu.memory_space<vmem>>, %arg11: memref<1x64xf32, #tpu.memory_space<vmem>>, %arg12: memref<64x32xf32, #tpu.memory_space<vmem>>, %arg13: memref<1x32xf32, #tpu.memory_space<vmem>>, %arg14: memref<1x32xf32, #tpu.memory_space<vmem>>, %arg15: memref<1x32xf32, #tpu.memory_space<vmem>>, %arg16: memref<4x1x256xf32, #tpu.memory_space<vmem>>) attributes {dimension_semantics = [#tpu.dimension_semantics<parallel>], iteration_bounds = array<i64: 1>, scalar_prefetch = 0 : i64, scratch_operands = 0 : i64, tpu.core_type = #tpu.core_type<tc>, window_params = [{transform_indices = @transform_0, window_bounds = array<i64: 4, 8, 32>}, {transform_indices = @transform_1, window_bounds = array<i64: 4, 1, 8>}, {transform_indices = @transform_2, window_bounds = array<i64: 4, 8, 1>}, {pipeline_mode = #tpu.pipeline_mode<synchronous>, transform_indices = @transform_3, window_bounds = array<i64: 32, 96>}, {pipeline_mode = #tpu.pipeline_mode<synchronous>, transform_indices = @transform_4, window_bounds = array<i64: 1, 96>}, {pipeline_mode = #tpu.pipeline_mode<synchronous>, transform_indices = @transform_5, window_bounds = array<i64: 32, 32>}, {pipeline_mode = #tpu.pipeline_mode<synchronous>, transform_indices = @transform_6, window_bounds = array<i64: 1, 32>}, {pipeline_mode = #tpu.pipeline_mode<synchronous>, transform_indices = @transform_7, window_bounds = array<i64: 1, 32>}, {pipeline_mode = #tpu.pipeline_mode<synchronous>, transform_indices = @transform_8, window_bounds = array<i64: 1, 32>}, {pipeline_mode = #tpu.pipeline_mode<synchronous>, transform_indices = @transform_9, window_bounds = array<i64: 32, 64>}, {pipeline_mode = #tpu.pipeline_mode<synchronous>, transform_indices = @transform_10, window_bounds = array<i64: 1, 64>}, {pipeline_mode = #tpu.pipeline_mode<synchronous>, transform_indices = @transform_11, window_bounds = array<i64: 64, 32>}, {pipeline_mode = #tpu.pipeline_mode<synchronous>, transform_indices = @transform_12, window_bounds = array<i64: 1, 32>}, {pipeline_mode = #tpu.pipeline_mode<synchronous>, transform_indices = @transform_13, window_bounds = array<i64: 1, 32>}, {pipeline_mode = #tpu.pipeline_mode<synchronous>, transform_indices = @transform_14, window_bounds = array<i64: 1, 32>}, {transform_indices = @transform_15, window_bounds = array<i64: 4, 1, 256>}]} {
    %c0 = arith.constant 0 : index
    %c0_0 = arith.constant 0 : index
    %c0_1 = arith.constant 0 : index
    %0 = vector.load %arg1[%c0, %c0_0, %c0_1] : memref<4x8x32xf32, #tpu.memory_space<vmem>>, vector<4x8x32xf32>
    %1 = vector.shape_cast %0 : vector<4x8x32xf32> to vector<32x32xf32>
    %c0_2 = arith.constant 0 : index
    %c0_3 = arith.constant 0 : index
    %c0_4 = arith.constant 0 : index
    %2 = vector.load %arg2[%c0_2, %c0_3, %c0_4] : memref<4x1x8xf32, #tpu.memory_space<vmem>>, vector<4x1x8xf32>
    %c0_5 = arith.constant 0 : index
    %c0_6 = arith.constant 0 : index
    %c0_7 = arith.constant 0 : index
    %3 = vector.load %arg3[%c0_5, %c0_6, %c0_7] : memref<4x8x1xf32, #tpu.memory_space<vmem>>, vector<4x8x1xf32>
    %4 = vector.shape_cast %3 : vector<4x8x1xf32> to vector<32x1xf32>
    %c0_8 = arith.constant 0 : index
    %c0_9 = arith.constant 0 : index
    %5 = vector.load %arg4[%c0_8, %c0_9] : memref<32x96xf32, #tpu.memory_space<vmem>>, vector<32x96xf32>
    %cst = arith.constant dense<0.000000e+00> : vector<32x96xf32>
    %6 = tpu.matmul %1, %5, %cst {dimension_numbers = #tpu.dot_dimension_numbers<[1], [0], [0], [1], [0, 0, 1, 1], [], []>} : vector<32x32xf32>, vector<32x96xf32>, vector<32x96xf32> -> vector<32x96xf32>
    %c0_10 = arith.constant 0 : index
    %c0_11 = arith.constant 0 : index
    %7 = vector.load %arg5[%c0_10, %c0_11] : memref<1x96xf32, #tpu.memory_space<vmem>>, vector<1x96xf32>
    %8 = vector.broadcast %7 : vector<1x96xf32> to vector<32x96xf32>
    %9 = arith.addf %6, %8 : vector<32x96xf32>
    %10 = vector.extract_strided_slice %9 {offsets = [0, 0], sizes = [32, 32], strides = [1, 1]} : vector<32x96xf32> to vector<32x32xf32>
    %11 = vector.extract_strided_slice %9 {offsets = [0, 32], sizes = [32, 32], strides = [1, 1]} : vector<32x96xf32> to vector<32x32xf32>
    %12 = vector.extract_strided_slice %9 {offsets = [0, 64], sizes = [32, 32], strides = [1, 1]} : vector<32x96xf32> to vector<32x32xf32>
    %13 = vector.shape_cast %10 : vector<32x32xf32> to vector<4x8x4x8xf32>
    %14 = tpu.transpose %13, [0, 2, 1, 3] : vector<4x8x4x8xf32> -> vector<4x4x8x8xf32>
    %15 = vector.shape_cast %14 : vector<4x4x8x8xf32> to vector<16x8x8xf32>
    %16 = vector.shape_cast %11 : vector<32x32xf32> to vector<4x8x4x8xf32>
    %17 = tpu.transpose %16, [0, 2, 1, 3] : vector<4x8x4x8xf32> -> vector<4x4x8x8xf32>
    %18 = vector.shape_cast %17 : vector<4x4x8x8xf32> to vector<16x8x8xf32>
    %19 = vector.shape_cast %12 : vector<32x32xf32> to vector<4x8x4x8xf32>
    %20 = tpu.transpose %19, [0, 2, 1, 3] : vector<4x8x4x8xf32> -> vector<4x4x8x8xf32>
    %21 = vector.shape_cast %20 : vector<4x4x8x8xf32> to vector<16x8x8xf32>
    "tpu.trace_start"() <{level = 10 : i32, message = "bqd,bkd->bqk"}> : () -> ()
    %cst_12 = arith.constant dense<0.000000e+00> : vector<16x8x8xf32>
    %22 = tpu.matmul %15, %18, %cst_12 {dimension_numbers = #tpu.dot_dimension_numbers<[2], [2], [1], [1], [0, 0, 0, 1, 1, 1], [0], [0]>} : vector<16x8x8xf32>, vector<16x8x8xf32>, vector<16x8x8xf32> -> vector<16x8x8xf32>
    "tpu.trace_stop"() : () -> ()
    %cst_13 = arith.constant 0.353553385 : f32
    %23 = vector.broadcast %cst_13 : f32 to vector<16x8x8xf32>
    %24 = arith.mulf %22, %23 : vector<16x8x8xf32>
    %cst_14 = arith.constant 1.000000e+00 : f32
    %25 = vector.broadcast %cst_14 : f32 to vector<4x1x8xf32>
    %26 = arith.subf %2, %25 : vector<4x1x8xf32>
    %cst_15 = arith.constant 1.000000e+30 : f32
    %27 = vector.broadcast %cst_15 : f32 to vector<4x1x8xf32>
    %28 = arith.mulf %26, %27 : vector<4x1x8xf32>
    %29 = vector.shape_cast %28 : vector<4x1x8xf32> to vector<4x1x1x8xf32>
    %30 = vector.shape_cast %29 : vector<4x1x1x8xf32> to vector<4x1x1x8xf32>
    %31 = vector.broadcast %30 : vector<4x1x1x8xf32> to vector<4x4x1x8xf32>
    %32 = vector.shape_cast %31 : vector<4x4x1x8xf32> to vector<16x1x8xf32>
    %33 = vector.broadcast %32 : vector<16x1x8xf32> to vector<16x8x8xf32>
    %34 = arith.addf %24, %33 : vector<16x8x8xf32>
    %cst_16 = arith.constant dense<0xFF800000> : vector<16x8xf32>
    %35 = vector.multi_reduction <maximumf>, %34, %cst_16 [2] : vector<16x8x8xf32> to vector<16x8xf32>
    %36 = vector.shape_cast %35 : vector<16x8xf32> to vector<16x8x1xf32>
    %37 = vector.broadcast %36 : vector<16x8x1xf32> to vector<16x8x8xf32>
    %38 = arith.subf %34, %37 : vector<16x8x8xf32>
    %39 = math.exp %38 : vector<16x8x8xf32>
    %cst_17 = arith.constant dense<0.000000e+00> : vector<16x8xf32>
    %40 = vector.multi_reduction <add>, %39, %cst_17 [2] : vector<16x8x8xf32> to vector<16x8xf32>
    %41 = vector.shape_cast %40 : vector<16x8xf32> to vector<16x8x1xf32>
    %42 = tpu.reciprocal %41 : vector<16x8x1xf32> -> vector<16x8x1xf32>
    %43 = vector.broadcast %42 : vector<16x8x1xf32> to vector<16x8x8xf32>
    %44 = arith.mulf %39, %43 : vector<16x8x8xf32>
    "tpu.trace_start"() <{level = 10 : i32, message = "bqk,bkd->bqd"}> : () -> ()
    %cst_18 = arith.constant dense<0.000000e+00> : vector<16x8x8xf32>
    %45 = tpu.matmul %44, %21, %cst_18 {dimension_numbers = #tpu.dot_dimension_numbers<[2], [1], [1], [2], [0, 0, 0, 1, 1, 2], [0], [0]>} : vector<16x8x8xf32>, vector<16x8x8xf32>, vector<16x8x8xf32> -> vector<16x8x8xf32>
    "tpu.trace_stop"() : () -> ()
    %46 = vector.shape_cast %45 : vector<16x8x8xf32> to vector<4x4x8x8xf32>
    %47 = tpu.transpose %46, [0, 2, 1, 3] : vector<4x4x8x8xf32> -> vector<4x8x4x8xf32>
    %48 = vector.shape_cast %47 : vector<4x8x4x8xf32> to vector<32x32xf32>
    %c0_19 = arith.constant 0 : index
    %c0_20 = arith.constant 0 : index
    %49 = vector.load %arg6[%c0_19, %c0_20] : memref<32x32xf32, #tpu.memory_space<vmem>>, vector<32x32xf32>
    %cst_21 = arith.constant dense<0.000000e+00> : vector<32x32xf32>
    %50 = tpu.matmul %48, %49, %cst_21 {dimension_numbers = #tpu.dot_dimension_numbers<[1], [0], [0], [1], [0, 0, 1, 1], [], []>} : vector<32x32xf32>, vector<32x32xf32>, vector<32x32xf32> -> vector<32x32xf32>
    %51 = vector.broadcast %4 : vector<32x1xf32> to vector<32x32xf32>
    %52 = arith.mulf %50, %51 : vector<32x32xf32>
    %c0_22 = arith.constant 0 : index
    %c0_23 = arith.constant 0 : index
    %53 = vector.load %arg7[%c0_22, %c0_23] : memref<1x32xf32, #tpu.memory_space<vmem>>, vector<1x32xf32>
    %54 = vector.broadcast %53 : vector<1x32xf32> to vector<32x32xf32>
    %55 = arith.addf %52, %54 : vector<32x32xf32>
    %56 = arith.addf %1, %55 : vector<32x32xf32>
    %57 = vector.shape_cast %56 : vector<32x32xf32> to vector<4x8x32xf32>
    %cst_24 = arith.constant dense<0.000000e+00> : vector<4x32xf32>
    %58 = vector.multi_reduction <add>, %57, %cst_24 [1] : vector<4x8x32xf32> to vector<4x32xf32>
    %59 = vector.shape_cast %58 : vector<4x32xf32> to vector<4x1x32xf32>
    %cst_25 = arith.constant 8.000000e+00 : f32
    %60 = vector.broadcast %cst_25 : f32 to vector<4x1x32xf32>
    %61 = arith.divf %59, %60 : vector<4x1x32xf32>
    %62 = vector.broadcast %61 : vector<4x1x32xf32> to vector<4x8x32xf32>
    %63 = arith.subf %57, %62 : vector<4x8x32xf32>
    %64 = arith.mulf %63, %63 : vector<4x8x32xf32>
    %cst_26 = arith.constant dense<0.000000e+00> : vector<4x32xf32>
    %65 = vector.multi_reduction <add>, %64, %cst_26 [1] : vector<4x8x32xf32> to vector<4x32xf32>
    %66 = vector.shape_cast %65 : vector<4x32xf32> to vector<4x1x32xf32>
    %cst_27 = arith.constant 7.000000e+00 : f32
    %67 = vector.broadcast %cst_27 : f32 to vector<4x1x32xf32>
    %68 = arith.divf %66, %67 : vector<4x1x32xf32>
    %69 = vector.broadcast %61 : vector<4x1x32xf32> to vector<4x8x32xf32>
    %70 = arith.subf %57, %69 : vector<4x8x32xf32>
    %71 = math.sqrt %68 : vector<4x1x32xf32>
    %72 = vector.broadcast %71 : vector<4x1x32xf32> to vector<4x8x32xf32>
    %73 = arith.divf %70, %72 : vector<4x8x32xf32>
    %c0_28 = arith.constant 0 : index
    %c0_29 = arith.constant 0 : index
    %74 = vector.load %arg8[%c0_28, %c0_29] : memref<1x32xf32, #tpu.memory_space<vmem>>, vector<1x32xf32>
    %75 = vector.shape_cast %74 : vector<1x32xf32> to vector<1x1x32xf32>
    %76 = vector.broadcast %75 : vector<1x1x32xf32> to vector<4x8x32xf32>
    %77 = arith.mulf %73, %76 : vector<4x8x32xf32>
    %c0_30 = arith.constant 0 : index
    %c0_31 = arith.constant 0 : index
    %78 = vector.load %arg9[%c0_30, %c0_31] : memref<1x32xf32, #tpu.memory_space<vmem>>, vector<1x32xf32>
    %79 = vector.shape_cast %78 : vector<1x32xf32> to vector<1x1x32xf32>
    %80 = vector.broadcast %79 : vector<1x1x32xf32> to vector<4x8x32xf32>
    %81 = arith.addf %77, %80 : vector<4x8x32xf32>
    %82 = vector.shape_cast %81 : vector<4x8x32xf32> to vector<32x32xf32>
    %c0_32 = arith.constant 0 : index
    %c0_33 = arith.constant 0 : index
    %83 = vector.load %arg10[%c0_32, %c0_33] : memref<32x64xf32, #tpu.memory_space<vmem>>, vector<32x64xf32>
    %cst_34 = arith.constant dense<0.000000e+00> : vector<32x64xf32>
    %84 = tpu.matmul %82, %83, %cst_34 {dimension_numbers = #tpu.dot_dimension_numbers<[1], [0], [0], [1], [0, 0, 1, 1], [], []>} : vector<32x32xf32>, vector<32x64xf32>, vector<32x64xf32> -> vector<32x64xf32>
    %c0_35 = arith.constant 0 : index
    %c0_36 = arith.constant 0 : index
    %85 = vector.load %arg11[%c0_35, %c0_36] : memref<1x64xf32, #tpu.memory_space<vmem>>, vector<1x64xf32>
    %86 = vector.broadcast %85 : vector<1x64xf32> to vector<32x64xf32>
    %87 = arith.addf %84, %86 : vector<32x64xf32>
    %cst_37 = arith.constant 0.000000e+00 : f32
    %88 = vector.broadcast %cst_37 : f32 to vector<32x64xf32>
    %89 = arith.maximumf %87, %88 : vector<32x64xf32>
    %c0_38 = arith.constant 0 : index
    %c0_39 = arith.constant 0 : index
    %90 = vector.load %arg12[%c0_38, %c0_39] : memref<64x32xf32, #tpu.memory_space<vmem>>, vector<64x32xf32>
    %cst_40 = arith.constant dense<0.000000e+00> : vector<32x32xf32>
    %91 = tpu.matmul %89, %90, %cst_40 {dimension_numbers = #tpu.dot_dimension_numbers<[1], [0], [0], [1], [0, 0, 1, 1], [], []>} : vector<32x64xf32>, vector<64x32xf32>, vector<32x32xf32> -> vector<32x32xf32>
    %c0_41 = arith.constant 0 : index
    %c0_42 = arith.constant 0 : index
    %92 = vector.load %arg13[%c0_41, %c0_42] : memref<1x32xf32, #tpu.memory_space<vmem>>, vector<1x32xf32>
    %93 = vector.broadcast %92 : vector<1x32xf32> to vector<32x32xf32>
    %94 = arith.addf %91, %93 : vector<32x32xf32>
    %95 = arith.addf %82, %94 : vector<32x32xf32>
    %96 = vector.shape_cast %95 : vector<32x32xf32> to vector<4x8x32xf32>
    %cst_43 = arith.constant dense<0.000000e+00> : vector<4x32xf32>
    %97 = vector.multi_reduction <add>, %96, %cst_43 [1] : vector<4x8x32xf32> to vector<4x32xf32>
    %98 = vector.shape_cast %97 : vector<4x32xf32> to vector<4x1x32xf32>
    %cst_44 = arith.constant 8.000000e+00 : f32
    %99 = vector.broadcast %cst_44 : f32 to vector<4x1x32xf32>
    %100 = arith.divf %98, %99 : vector<4x1x32xf32>
    %101 = vector.broadcast %100 : vector<4x1x32xf32> to vector<4x8x32xf32>
    %102 = arith.subf %96, %101 : vector<4x8x32xf32>
    %103 = arith.mulf %102, %102 : vector<4x8x32xf32>
    %cst_45 = arith.constant dense<0.000000e+00> : vector<4x32xf32>
    %104 = vector.multi_reduction <add>, %103, %cst_45 [1] : vector<4x8x32xf32> to vector<4x32xf32>
    %105 = vector.shape_cast %104 : vector<4x32xf32> to vector<4x1x32xf32>
    %cst_46 = arith.constant 7.000000e+00 : f32
    %106 = vector.broadcast %cst_46 : f32 to vector<4x1x32xf32>
    %107 = arith.divf %105, %106 : vector<4x1x32xf32>
    %108 = vector.broadcast %100 : vector<4x1x32xf32> to vector<4x8x32xf32>
    %109 = arith.subf %96, %108 : vector<4x8x32xf32>
    %110 = math.sqrt %107 : vector<4x1x32xf32>
    %111 = vector.broadcast %110 : vector<4x1x32xf32> to vector<4x8x32xf32>
    %112 = arith.divf %109, %111 : vector<4x8x32xf32>
    %c0_47 = arith.constant 0 : index
    %c0_48 = arith.constant 0 : index
    %113 = vector.load %arg14[%c0_47, %c0_48] : memref<1x32xf32, #tpu.memory_space<vmem>>, vector<1x32xf32>
    %114 = vector.shape_cast %113 : vector<1x32xf32> to vector<1x1x32xf32>
    %115 = vector.broadcast %114 : vector<1x1x32xf32> to vector<4x8x32xf32>
    %116 = arith.mulf %112, %115 : vector<4x8x32xf32>
    %c0_49 = arith.constant 0 : index
    %c0_50 = arith.constant 0 : index
    %117 = vector.load %arg15[%c0_49, %c0_50] : memref<1x32xf32, #tpu.memory_space<vmem>>, vector<1x32xf32>
    %118 = vector.shape_cast %117 : vector<1x32xf32> to vector<1x1x32xf32>
    %119 = vector.broadcast %118 : vector<1x1x32xf32> to vector<4x8x32xf32>
    %120 = arith.addf %116, %119 : vector<4x8x32xf32>
    %121 = vector.shape_cast %120 : vector<4x8x32xf32> to vector<4x1x256xf32>
    %c0_51 = arith.constant 0 : index
    %c0_52 = arith.constant 0 : index
    %c0_53 = arith.constant 0 : index
    %122 = vector.load %arg16[%c0_51, %c0_52, %c0_53] : memref<4x1x256xf32, #tpu.memory_space<vmem>>, vector<4x1x256xf32>
    tpu.vector_store %arg16[%c0_51, %c0_52, %c0_53], %121 {strides = array<i32>} : memref<4x1x256xf32, #tpu.memory_space<vmem>>, vector<4x1x256xf32>,
    return
  }
  func.func @transform_0(%arg0: i32) -> (i32, i32, i32) {
    %c0_i32 = arith.constant 0 : i32
    %c0_i32_0 = arith.constant 0 : i32
    %c0_i32_1 = arith.constant 0 : i32
    return %arg0, %c0_i32, %c0_i32_0 : i32, i32, i32
  }
  func.func @transform_1(%arg0: i32) -> (i32, i32, i32) {
    %c0_i32 = arith.constant 0 : i32
    %c0_i32_0 = arith.constant 0 : i32
    %c0_i32_1 = arith.constant 0 : i32
    return %arg0, %c0_i32, %c0_i32_0 : i32, i32, i32
  }
  func.func @transform_2(%arg0: i32) -> (i32, i32, i32) {
    %c0_i32 = arith.constant 0 : i32
    %c0_i32_0 = arith.constant 0 : i32
    %c0_i32_1 = arith.constant 0 : i32
    return %arg0, %c0_i32, %c0_i32_0 : i32, i32, i32
  }
  func.func @transform_3(%arg0: i32) -> (i32, i32) {
    %c0_i32 = arith.constant 0 : i32
    %c0_i32_0 = arith.constant 0 : i32
    %c0_i32_1 = arith.constant 0 : i32
    return %c0_i32, %c0_i32_0 : i32, i32
  }
  func.func @transform_4(%arg0: i32) -> (i32, i32) {
    %c0_i32 = arith.constant 0 : i32
    %c0_i32_0 = arith.constant 0 : i32
    %c0_i32_1 = arith.constant 0 : i32
    return %c0_i32, %c0_i32_0 : i32, i32
  }
  func.func @transform_5(%arg0: i32) -> (i32, i32) {
    %c0_i32 = arith.constant 0 : i32
    %c0_i32_0 = arith.constant 0 : i32
    %c0_i32_1 = arith.constant 0 : i32
    return %c0_i32, %c0_i32_0 : i32, i32
  }
  func.func @transform_6(%arg0: i32) -> (i32, i32) {
    %c0_i32 = arith.constant 0 : i32
    %c0_i32_0 = arith.constant 0 : i32
    %c0_i32_1 = arith.constant 0 : i32
    return %c0_i32, %c0_i32_0 : i32, i32
  }
  func.func @transform_7(%arg0: i32) -> (i32, i32) {
    %c0_i32 = arith.constant 0 : i32
    %c0_i32_0 = arith.constant 0 : i32
    %c0_i32_1 = arith.constant 0 : i32
    return %c0_i32, %c0_i32_0 : i32, i32
  }
  func.func @transform_8(%arg0: i32) -> (i32, i32) {
    %c0_i32 = arith.constant 0 : i32
    %c0_i32_0 = arith.constant 0 : i32
    %c0_i32_1 = arith.constant 0 : i32
    return %c0_i32, %c0_i32_0 : i32, i32
  }
  func.func @transform_9(%arg0: i32) -> (i32, i32) {
    %c0_i32 = arith.constant 0 : i32
    %c0_i32_0 = arith.constant 0 : i32
    %c0_i32_1 = arith.constant 0 : i32
    return %c0_i32, %c0_i32_0 : i32, i32
  }
  func.func @transform_10(%arg0: i32) -> (i32, i32) {
    %c0_i32 = arith.constant 0 : i32
    %c0_i32_0 = arith.constant 0 : i32
    %c0_i32_1 = arith.constant 0 : i32
    return %c0_i32, %c0_i32_0 : i32, i32
  }
  func.func @transform_11(%arg0: i32) -> (i32, i32) {
    %c0_i32 = arith.constant 0 : i32
    %c0_i32_0 = arith.constant 0 : i32
    %c0_i32_1 = arith.constant 0 : i32
    return %c0_i32, %c0_i32_0 : i32, i32
  }
  func.func @transform_12(%arg0: i32) -> (i32, i32) {
    %c0_i32 = arith.constant 0 : i32
    %c0_i32_0 = arith.constant 0 : i32
    %c0_i32_1 = arith.constant 0 : i32
    return %c0_i32, %c0_i32_0 : i32, i32
  }
  func.func @transform_13(%arg0: i32) -> (i32, i32) {
    %c0_i32 = arith.constant 0 : i32
    %c0_i32_0 = arith.constant 0 : i32
    %c0_i32_1 = arith.constant 0 : i32
    return %c0_i32, %c0_i32_0 : i32, i32
  }
  func.func @transform_14(%arg0: i32) -> (i32, i32) {
    %c0_i32 = arith.constant 0 : i32
    %c0_i32_0 = arith.constant 0 : i32
    %c0_i32_1 = arith.constant 0 : i32
    return %c0_i32, %c0_i32_0 : i32, i32
  }
  func.func @transform_15(%arg0: i32) -> (i32, i32, i32) {
    %c0_i32 = arith.constant 0 : i32
    %c0_i32_0 = arith.constant 0 : i32
    %c0_i32_1 = arith.constant 0 : i32
    return %arg0, %c0_i32, %c0_i32_0 : i32, i32, i32
  }
}

</mosaic_0001>

<bundles_post_ra>
// kernel: tpu_custom_call.1
= control target key start
LH: loop header
LB: loop body
LE: loop exit
PB: predicated region body
PF: predicated region fallthrough
CT: control target
= control target key end

     0   :  { %vm74_vm0 = vcmask 261120   ;;  %s8253_s0 = inlined_call_operand.vmem [shape: f32[4,8,32], index: 0, kind: input, shape index: {}]   ;;  %s8254_s1 = inlined_call_operand.vmem [shape: f32[4,1,8], index: 1, kind: input, shape index: {}]   ;;  %s8255_s2 = inlined_call_operand.vmem [shape: f32[4,8,1], index: 2, kind: input, shape index: {}]   ;;  %s8256_s3 = inlined_call_operand.vmem [shape: f32[32,96], index: 3, kind: input, shape index: {}]   ;;  %s8257_s4 = inlined_call_operand.vmem [shape: f32[1,96], index: 4, kind: input, shape index: {}]   ;;  %s8258_s5 = inlined_call_operand.vmem [shape: f32[32,32], index: 5, kind: input, shape index: {}]   ;;  %s8259_s6 = inlined_call_operand.vmem [shape: f32[1,32], index: 6, kind: input, shape index: {}]   ;;  %s8260_s7 = inlined_call_operand.vmem [shape: f32[1,32], index: 7, kind: input, shape index: {}]   ;;  %s8261_s8 = inlined_call_operand.vmem [shape: f32[1,32], index: 8, kind: input, shape index: {}]   ;;  %s8262_s9 = inlined_call_operand.vmem [shape: f32[32,64], index: 9, kind: input, shape index: {}]   ;;  %s8263_s10 = inlined_call_operand.vmem [shape: f32[1,64], index: 10, kind: input, shape index: {}]   ;;  %s8264_s11 = inlined_call_operand.vmem [shape: f32[64,32], index: 11, kind: input, shape index: {}]   ;;  %s8265_s12 = inlined_call_operand.vmem [shape: f32[1,32], index: 12, kind: input, shape index: {}]   ;;  %s8266_s13 = inlined_call_operand.vmem [shape: f32[1,32], index: 13, kind: input, shape index: {}]   ;;  %s8267_s14 = inlined_call_operand.vmem [shape: f32[1,32], index: 14, kind: input, shape index: {}]   ;;  %s8268_s15 = inlined_call_operand.hbm [shape: f32[4,1,256], index: 15, kind: output, shape index: {}]  }
   0x1   :  { %v66_v0 = vld [vmem:[%s8256_s3 + $0x18] sm:$0xff]  ;;  %v65_v1 = vld [vmem:[%s8256_s3 + $0x10] sm:$0xff]  ;;  %v51_v2 = vld [vmem:[%s8253_s0] sm:$0xff] }
   0x2   :  { %6423 = vmatprep.subr.mxu0 %v66_v0  ;;  %v64_v3 = vld [vmem:[%s8256_s3 + $0x8] sm:$0xff]  ;;  %6431 = vmatprep.mubr.msk.f32.mxu0 %vm74_vm0, %v51_v2 }
   0x3   :  { %6424 = vmatpush3.msra.mxu0 %v66_v0 }
   0x4   :  { %20 = vsyncpa [#allocation3], 0  ;;  %6425 = vmatprep.subr.mxu0 %v65_v1  ;;  %v63_v4 = vld [vmem:[%s8256_s3] sm:$0xff]  ;;  %v52_v5 = vld [vmem:[%s8253_s0 + $0x8] sm:$0xff]  ;;  %s6788_s20 = smov 104   ;;  %s6789_s21 = smov 120   ;;  %v8269_v32 = vlaneseq }
   0x5   :  { %6426 = vmatpush3.msra.mxu0 %v65_v1  ;;  %v53_v6 = vld [vmem:[%s8253_s0 + $0x10] sm:$0xff]  ;;  %v54_v7 = vld [vmem:[%s8253_s0 + $0x18] sm:$0xff]  ;;  %v6215_v9 = vld [vmem:[%s8257_s4] ss:$0 sm:$0xff]  ;;  %s6790_s22 = smov 112   ;;  %s6791_s4 = smov 96  }
   0x6   :  { %6427 = vmatprep.subr.mxu0 %v64_v3  ;;  %v6792_v27 = vmov 0.0   ;;  %vm6793_vm1 = vmmov 0   ;;  %s6794_s23 = smov 64   ;;  %v6795_v30 = vmov 1983009808   ;;  %v7015_v34 = vshrl.u32 %v8269_v32, 7 }
   0x7   :  { %6428 = vmatpush3.msra.mxu0 %v64_v3  ;;  %6442 = vmatprep.subr.mxu1 %v6792_v27  ;;  %v215_v31 = vunpack.c.l.s4 %v6795_v30  ;;  %v6796_v35 = vmov 1934713408   ;;  %vm1940_vm2 = vcmask 64512   ;;  %s6798_s3 = smov 16   ;;  %s6799_s24 = smov 24   ;;  %vm5161_vm3 = vcmask 130048  }
   0x8   :  { %6429 = vmatprep.subr.mxu0 %v63_v4  ;;  %6444 = vmatprep.mubr.msk.f32.mxu1 %vm6793_vm1, %v6792_v27  ;;  %v247_v36 = vunpack.c.l.s4 %v6796_v35  ;;  %vm5166_vm4 = vcmask 195584   ;;  %vm5570_vm13 = vcmask 523264  }
   0x9   :  { %6430 = vmatpush3.msra.mxu0 %v63_v4  ;;  %v216_v33 = vunpack.c.0.s8 %v215_v31 }
   0xa   :  { %6432 = vmatmul.mubr.msk.f32.vlgmr.msra.gmra.mxu0 %vm74_vm0, %v52_v5  ;;  %6437 = vmatprep.subr.mxu0 %v6792_v27  ;;  %v248_v46 = vunpack.c.0.s8 %v247_v36 }
   0xb   :  { %6434 = vmatprep.mubr.msk.f32.mxu0 %vm74_vm0, %v53_v6  ;;  %v7020_v39 = vsub.s32 %v216_v33, %v7015_v34 }
   0xc   :  { %v7045_v57 = vsub.s32 %v248_v46, %v7015_v34 }
   0xe   :  { %6435 = vmatmul.mubr.msk.f32.gmra.mxu0 %vm74_vm0, %v54_v7 }
   0xf   :  { %6439 = vmatprep.mubr.msk.f32.mxu0 %vm6793_vm1, %v6792_v27 }
  0xca   :  { %v6433_v8 = vpop.f32.mrf.mxu0 }
  0xcb   :  { %v6920_v13 = vadd.f32 %v6433_v8, %v6215_v9 }
  0xcc   :  { %v153_v10 = vpop.f32.mrf.mxu0 }
  0xcd   :  { %v6916_v11 = vadd.f32 %v6215_v9, %v153_v10 }
  0xce   :  { %v6436_v12 = vpop.f32.mrf.mxu0 }
  0xcf   :  { %200 = vrot.lane.b32.xlu1 %v6916_v11, %s6788_s20  ;;  %176 = vrot.lane.b32.xlu0 %v6916_v11, %s6789_s21  ;;  %v6928_v16 = vadd.f32 %v6436_v12, %v6215_v9 }
  0xd0   :  { %v163_v14 = vpop.f32.mrf.mxu0 }
  0xd1   :  { %v6926_v15 = vadd.f32 %v6215_v9, %v163_v14 }
  0xd3   :  { %178 = vrot.lane.b32.xlu1 %v6920_v13, %s6789_s21  ;;  %188 = vrot.lane.b32.xlu0 %v6916_v11, %s6790_s22 }
  0xd7   :  { %202 = vrot.lane.b32.xlu1 %v6920_v13, %s6788_s20  ;;  %190 = vrot.lane.b32.xlu0 %v6920_v13, %s6790_s22 }
  0xdb   :  { %192 = vrot.lane.b32.xlu1 %v6926_v15, %s6790_s22  ;;  %180 = vrot.lane.b32.xlu0 %v6926_v15, %s6789_s21 }
  0xdf   :  { %182 = vrot.lane.b32.xlu1 %v6928_v16, %s6789_s21  ;;  %204 = vrot.lane.b32.xlu0 %v6926_v15, %s6788_s20 }
  0xe3   :  { %206 = vrot.lane.b32.xlu1 %v6928_v16, %s6788_s20  ;;  %194 = vrot.lane.b32.xlu0 %v6928_v16, %s6790_s22 }
  0xe7   :  { %756 = vrot.lane.b32.xlu0 %v6916_v11, %s6791_s4 }
 0x141   :  { %v6938_v17 = vpop.permute.xlu1 %200  ;;  %v6940_v18 = vpop.permute.xlu0 %176 }
 0x142   :  { %764 = vrot.lane.b32.xlu1 %v6940_v18, %s6791_s4  ;;  %v228_v40 = vcombine.low %v6940_v18, %v6938_v17  ;;  %v229_v43 = vcombine.high %v6940_v18, %v6938_v17 }
 0x144   :  { %v236_v49 = vrot.slane %v228_v40, %v7020_v39  ;;  %v243_v53 = vrot.slane %v229_v43, %v7020_v39 }
 0x145   :  { %v6944_v19 = vpop.permute.xlu1 %178  ;;  %v189_v20 = vpop.permute.xlu0 %188 }
 0x146   :  { %780 = vrot.lane.b32.xlu1 %v6938_v17, %s6791_s4  ;;  %772 = vrot.lane.b32.xlu0 %v189_v20, %s6791_s4  ;;  %v212_v37 = vcombine.low %v6916_v11, %v189_v20  ;;  %v213_v38 = vcombine.high %v6916_v11, %v189_v20 }
 0x148   :  { %v220_v47 = vrot.slane %v212_v37, %v7020_v39  ;;  %v227_v48 = vrot.slane %v213_v38, %v7020_v39 }
 0x149   :  { %v6949_v21 = vpop.permute.xlu0 %190  ;;  %v203_v22 = vpop.permute.xlu1 %202 }
 0x14a   :  { %766 = vrot.lane.b32.xlu1 %v6944_v19, %s6791_s4  ;;  %758 = vrot.lane.b32.xlu0 %v6920_v13, %s6791_s4  ;;  %v296_v41 = vcombine.low %v6944_v19, %v203_v22  ;;  %v280_v42 = vcombine.low %v6920_v13, %v6949_v21  ;;  %v297_v44 = vcombine.high %v6944_v19, %v203_v22 }
 0x14b   :  { %v281_v45 = vcombine.high %v6920_v13, %v6949_v21  ;;  %v244_v58 = vcombine.low %v220_v47, %v236_v49  ;;  %v245_v59 = vcombine.high %v220_v47, %v236_v49  ;;  %v260_v60 = vcombine.low %v227_v48, %v243_v53 }
 0x14c   :  { %v304_v50 = vrot.slane %v296_v41, %v7020_v39  ;;  %v288_v51 = vrot.slane %v280_v42, %v7020_v39  ;;  %v311_v54 = vrot.slane %v297_v44, %v7020_v39  ;;  %v261_v61 = vcombine.high %v227_v48, %v243_v53 }
 0x14d   :  { %v6956_v23 = vpop.permute.xlu0 %180  ;;  %v6960_v24 = vpop.permute.xlu1 %192  ;;  %v295_v55 = vrot.slane %v281_v45, %v7020_v39  ;;  %v252_v10 = vrot.slane %v244_v58, %v7045_v57  ;;  %v268_v12 = vrot.slane %v260_v60, %v7045_v57 }
 0x14e   :  { %782 = vrot.lane.b32.xlu1 %v203_v22, %s6791_s4  ;;  %774 = vrot.lane.b32.xlu0 %v6949_v21, %s6791_s4  ;;  %v348_v56 = vcombine.low %v6926_v15, %v6960_v24  ;;  %v312_v62 = vcombine.low %v288_v51, %v304_v50  ;;  %v313_v63 = vcombine.high %v288_v51, %v304_v50 }
 0x14f   :  { %v328_v2 = vcombine.low %v295_v55, %v311_v54  ;;  %v329_v3 = vcombine.high %v295_v55, %v311_v54  ;;  %v349_v4 = vcombine.high %v6926_v15, %v6960_v24 }
 0x150   :  { %v356_v5 = vrot.slane %v348_v56, %v7020_v39  ;;  %v320_v14 = vrot.slane %v312_v62, %v7045_v57 }
 0x151   :  { %v6966_v25 = vpop.permute.xlu0 %204  ;;  %v6970_v26 = vpop.permute.xlu1 %182 }
 0x152   :  { %768 = vrot.lane.b32.xlu1 %v6956_v23, %s6791_s4  ;;  %760 = vrot.lane.b32.xlu0 %v6926_v15, %s6791_s4  ;;  %v364_v52 = vcombine.low %v6956_v23, %v6966_v25  ;;  %v365_v0 = vcombine.high %v6956_v23, %v6966_v25 }
 0x154   :  { %v372_v1 = vrot.slane %v364_v52, %v7020_v39 }
 0x155   :  { %v6984_v28 = vpop.permute.xlu1 %206  ;;  %v6986_v29 = vpop.permute.xlu0 %194 }
 0x156   :  { %784 = vrot.lane.b32.xlu1 %v6966_v25, %s6791_s4  ;;  %776 = vrot.lane.b32.xlu0 %v6960_v24, %s6791_s4  ;;  %v432_v6 = vcombine.low %v6970_v26, %v6984_v28  ;;  %v433_v7 = vcombine.high %v6970_v26, %v6984_v28  ;;  %v416_v8 = vcombine.low %v6928_v16, %v6986_v29 }
 0x157   :  { %v417_v9 = vcombine.high %v6928_v16, %v6986_v29 }
 0x159   :  { %v431_v30 = vrot.slane %v417_v9, %v7020_v39 }
 0x15a   :  { %770 = vrot.lane.b32.xlu1 %v6970_v26, %s6791_s4  ;;  %762 = vrot.lane.b32.xlu0 %v6928_v16, %s6791_s4 }
 0x15e   :  { %786 = vrot.lane.b32.xlu1 %v6984_v28, %s6791_s4  ;;  %778 = vrot.lane.b32.xlu0 %v6986_v29, %s6791_s4 }
 0x162   :  { %1348 = vrot.lane.b32.xlu1 %v6916_v11, %s6794_s23  ;;  %1356 = vrot.lane.b32.xlu0 %v6940_v18, %s6794_s23  ;;  %v259_v11 = vrot.slane %v245_v59, %v7045_v57  ;;  %v381_v18 = vcombine.high %v356_v5, %v372_v1 }
 0x164   :  { %v484_v31 = vcombine.low %v252_v10, %v259_v11  ;;  %v6220_v33 = vcombine.high %v252_v10, %v259_v11  ;;  %v395_v38 = vrot.slane %v381_v18, %v7045_v57 }
 0x166   :  { %1364 = vrot.lane.b32.xlu1 %v189_v20, %s6794_s23  ;;  %1358 = vrot.lane.b32.xlu0 %v6944_v19, %s6794_s23  ;;  %v327_v19 = vrot.slane %v313_v63, %v7045_v57  ;;  %v336_v20 = vrot.slane %v328_v2, %v7045_v57  ;;  %v491_v50 = vrot.slane %v484_v31, %v7020_v39 }
 0x167   :  { %v499_v51 = vrot.slane %v6220_v33, %v7020_v39 }
 0x168   :  { %v552_v42 = vcombine.low %v320_v14, %v327_v19  ;;  %v6222_v43 = vcombine.high %v320_v14, %v327_v19 }
 0x16a   :  { %1372 = vrot.lane.b32.xlu1 %v6938_v17, %s6794_s23  ;;  %1360 = vrot.lane.b32.xlu0 %v6956_v23, %s6794_s23  ;;  %v380_v17 = vcombine.low %v356_v5, %v372_v1  ;;  %v440_v23 = vrot.slane %v432_v6, %v7020_v39  ;;  %v559_v59 = vrot.slane %v552_v42, %v7020_v39 }
 0x16b   :  { %v567_v60 = vrot.slane %v6222_v43, %v7020_v39  ;;  %v517_v5 = vcombine.high %v491_v50, %v499_v51 }
 0x16c   :  { %v388_v37 = vrot.slane %v380_v17, %v7045_v57 }
 0x16d   :  { %v584_v9 = vcombine.low %v559_v59, %v567_v60 }
 0x16e   :  { %1350 = vrot.lane.b32.xlu1 %v6920_v13, %s6794_s23  ;;  %v275_v13 = vrot.slane %v261_v61, %v7045_v57  ;;  %v620_v56 = vcombine.low %v388_v37, %v395_v38  ;;  %v6224_v58 = vcombine.high %v388_v37, %v395_v38 }
 0x170   :  { %v500_v35 = vcombine.low %v268_v12, %v275_v13  ;;  %v6221_v36 = vcombine.high %v268_v12, %v275_v13  ;;  %v627_v11 = vrot.slane %v620_v56, %v7020_v39  ;;  %v635_v12 = vrot.slane %v6224_v58, %v7020_v39 }
 0x172   :  { %1366 = vrot.lane.b32.xlu1 %v6949_v21, %s6794_s23  ;;  %v343_v21 = vrot.slane %v329_v3, %v7045_v57  ;;  %v507_v52 = vrot.slane %v500_v35, %v7020_v39  ;;  %v515_v53 = vrot.slane %v6221_v36, %v7020_v39  ;;  %v516_v3 = vcombine.low %v491_v50, %v499_v51  ;;  %v757_v36 = vpop.permute.xlu0 %756 }
 0x173   :  { %v652_v33 = vcombine.low %v627_v11, %v635_v12  ;;  %v653_v35 = vcombine.high %v627_v11, %v635_v12 }
 0x174   :  { %v568_v44 = vcombine.low %v336_v20, %v343_v21  ;;  %v6223_v45 = vcombine.high %v336_v20, %v343_v21  ;;  %v533_v6 = vcombine.high %v507_v52, %v515_v53  ;;  %v7094_v18 = vrot.slane %v516_v3, %v7045_v57 }
 0x175   :  { %v7100_v20 = vrot.slane %v517_v5, %v7045_v57 }
 0x176   :  { %1374 = vrot.lane.b32.xlu1 %v203_v22, %s6794_s23  ;;  %v363_v22 = vrot.slane %v349_v4, %v7020_v39  ;;  %v575_v61 = vrot.slane %v568_v44, %v7020_v39  ;;  %v583_v62 = vrot.slane %v6223_v45, %v7020_v39  ;;  %v532_v4 = vcombine.low %v507_v52, %v515_v53 }
 0x177   :  { %v7103_v21 = vrot.slane %v533_v6, %v7045_v57  ;;  %v7134_v52 = vrot.slane %v652_v33, %v7045_v57  ;;  %v7137_v53 = vrot.slane %v653_v35, %v7045_v57 }
 0x178   :  { %v600_v10 = vcombine.low %v575_v61, %v583_v62  ;;  %v7097_v19 = vrot.slane %v532_v4, %v7045_v57 }
 0x179   :  { %v550_v45 = vcombine.low %v7100_v20, %v7103_v21  ;;  %v551_v50 = vcombine.high %v7100_v20, %v7103_v21 }
 0x17a   :  { %1352 = vrot.lane.b32.xlu1 %v6926_v15, %s6794_s23  ;;  %v379_v15 = vrot.slane %v365_v0, %v7020_v39  ;;  %v7111_v31 = vrot.slane %v600_v10, %v7045_v57  ;;  %v548_v43 = vcombine.low %v7094_v18, %v7097_v19  ;;  %v549_v44 = vcombine.high %v7094_v18, %v7097_v19 }
 0x17c   :  { %v396_v40 = vcombine.low %v363_v22, %v379_v15  ;;  %v397_v41 = vcombine.high %v363_v22, %v379_v15  ;;  %v585_v22 = vcombine.high %v559_v59, %v567_v60 }
 0x17e   :  { %1368 = vrot.lane.b32.xlu1 %v6960_v24, %s6794_s23  ;;  %v447_v24 = vrot.slane %v433_v7, %v7020_v39  ;;  %v404_v54 = vrot.slane %v396_v40, %v7045_v57  ;;  %v411_v55 = vrot.slane %v397_v41, %v7045_v57 }
 0x180   :  { %v464_v48 = vcombine.low %v431_v30, %v447_v24  ;;  %v465_v49 = vcombine.high %v431_v30, %v447_v24  ;;  %v636_v7 = vcombine.low %v404_v54, %v411_v55  ;;  %v7108_v30 = vrot.slane %v584_v9, %v7045_v57 }
 0x182   :  { %1376 = vrot.lane.b32.xlu1 %v6966_v25, %s6794_s23  ;;  %v424_v25 = vrot.slane %v416_v8, %v7020_v39  ;;  %v472_v1 = vrot.slane %v464_v48, %v7045_v57  ;;  %v479_v2 = vrot.slane %v465_v49, %v7045_v57  ;;  %v6225_v8 = vcombine.high %v404_v54, %v411_v55 }
 0x183   :  { %v643_v24 = vrot.slane %v636_v7, %v7020_v39  ;;  %v616_v51 = vcombine.low %v7108_v30, %v7111_v31 }
 0x184   :  { %v448_v46 = vcombine.low %v424_v25, %v440_v23  ;;  %v449_v47 = vcombine.high %v424_v25, %v440_v23  ;;  %v704_v15 = vcombine.low %v472_v1, %v479_v2  ;;  %v6227_v17 = vcombine.high %v472_v1, %v479_v2 }
 0x185   :  { %v601_v23 = vcombine.high %v575_v61, %v583_v62  ;;  %v651_v25 = vrot.slane %v6225_v8, %v7020_v39  ;;  %v617_v1 = vcombine.high %v7108_v30, %v7111_v31 }
 0x186   :  { %v456_v63 = vrot.slane %v448_v46, %v7045_v57  ;;  %v463_v0 = vrot.slane %v449_v47, %v7045_v57  ;;  %v711_v41 = vrot.slane %v704_v15, %v7020_v39  ;;  %v719_v42 = vrot.slane %v6227_v17, %v7020_v39 }
 0x187   :  { %v7124_v46 = vrot.slane %v585_v22, %v7045_v57  ;;  %v7127_v47 = vrot.slane %v601_v23, %v7045_v57  ;;  %v668_v48 = vcombine.low %v643_v24, %v651_v25  ;;  %v669_v49 = vcombine.high %v643_v24, %v651_v25 }
 0x188   :  { %v688_v13 = vcombine.low %v456_v63, %v463_v0  ;;  %v6226_v14 = vcombine.high %v456_v63, %v463_v0  ;;  %v736_v58 = vcombine.low %v711_v41, %v719_v42  ;;  %v737_v60 = vcombine.high %v711_v41, %v719_v42 }
 0x189   :  { %v618_v2 = vcombine.low %v7124_v46, %v7127_v47  ;;  %v7144_v3 = vrot.slane %v668_v48, %v7045_v57  ;;  %v7147_v4 = vrot.slane %v669_v49, %v7045_v57  ;;  %v619_v24 = vcombine.high %v7124_v46, %v7127_v47 }
 0x18a   :  { %v695_v38 = vrot.slane %v688_v13, %v7020_v39  ;;  %v703_v40 = vrot.slane %v6226_v14, %v7020_v39  ;;  %v7157_v11 = vrot.slane %v736_v58, %v7045_v57  ;;  %v7163_v13 = vrot.slane %v737_v60, %v7045_v57 }
 0x18b   :  { %v684_v25 = vcombine.low %v7134_v52, %v7144_v3  ;;  %v685_v33 = vcombine.high %v7134_v52, %v7144_v3  ;;  %v686_v35 = vcombine.low %v7137_v53, %v7147_v4  ;;  %v687_v42 = vcombine.high %v7137_v53, %v7147_v4 }
 0x18c   :  { %v720_v56 = vcombine.low %v695_v38, %v703_v40  ;;  %v721_v59 = vcombine.high %v695_v38, %v703_v40 }
 0x18e   :  { %v7154_v10 = vrot.slane %v720_v56, %v7045_v57  ;;  %v7160_v12 = vrot.slane %v721_v59, %v7045_v57 }
 0x190   :  { %v752_v48 = vcombine.low %v7154_v10, %v7157_v11  ;;  %v753_v49 = vcombine.high %v7154_v10, %v7157_v11 }
 0x1b4   :  { %v765_v37 = vpop.permute.xlu1 %764 }
 0x1b8   :  { %v781_v54 = vpop.permute.xlu1 %780  ;;  %v773_v55 = vpop.permute.xlu0 %772 }
 0x1b9   :  { %v820_v61 = vcombine.low %v765_v37, %v781_v54  ;;  %v821_v62 = vcombine.high %v765_v37, %v781_v54  ;;  %v804_v63 = vcombine.low %v757_v36, %v773_v55  ;;  %v805_v0 = vcombine.high %v757_v36, %v773_v55 }
 0x1bb   :  { %v828_v5 = vrot.slane %v820_v61, %v7020_v39  ;;  %v835_v6 = vrot.slane %v821_v62, %v7020_v39  ;;  %v812_v7 = vrot.slane %v804_v63, %v7020_v39  ;;  %v819_v8 = vrot.slane %v805_v0, %v7020_v39 }
 0x1bc   :  { %v767_v9 = vpop.permute.xlu1 %766  ;;  %v759_v23 = vpop.permute.xlu0 %758 }
 0x1bd   :  { %v836_v14 = vcombine.low %v812_v7, %v828_v5  ;;  %v837_v15 = vcombine.high %v812_v7, %v828_v5  ;;  %v852_v17 = vcombine.low %v819_v8, %v835_v6  ;;  %v853_v22 = vcombine.high %v819_v8, %v835_v6 }
 0x1bf   :  { %v844_v36 = vrot.slane %v836_v14, %v7045_v57  ;;  %v851_v37 = vrot.slane %v837_v15, %v7045_v57  ;;  %v860_v38 = vrot.slane %v852_v17, %v7045_v57  ;;  %v867_v40 = vrot.slane %v853_v22, %v7045_v57 }
 0x1c0   :  { %v783_v41 = vpop.permute.xlu1 %782  ;;  %v775_v60 = vpop.permute.xlu0 %774 }
 0x1c1   :  { %v1076_v55 = vcombine.low %v844_v36, %v851_v37  ;;  %v6228_v56 = vcombine.high %v844_v36, %v851_v37  ;;  %v1092_v58 = vcombine.low %v860_v38, %v867_v40  ;;  %v6229_v59 = vcombine.high %v860_v38, %v867_v40 }
 0x1c2   :  { %v888_v61 = vcombine.low %v767_v9, %v783_v41  ;;  %v889_v62 = vcombine.high %v767_v9, %v783_v41  ;;  %v872_v63 = vcombine.low %v759_v23, %v775_v60  ;;  %v873_v0 = vcombine.high %v759_v23, %v775_v60 }
 0x1c3   :  { %v1083_v5 = vrot.slane %v1076_v55, %v7020_v39  ;;  %v1091_v6 = vrot.slane %v6228_v56, %v7020_v39  ;;  %v1099_v7 = vrot.slane %v1092_v58, %v7020_v39  ;;  %v1107_v8 = vrot.slane %v6229_v59, %v7020_v39 }
 0x1c4   :  { %v896_v14 = vrot.slane %v888_v61, %v7020_v39  ;;  %v903_v15 = vrot.slane %v889_v62, %v7020_v39  ;;  %v880_v17 = vrot.slane %v872_v63, %v7020_v39  ;;  %v887_v22 = vrot.slane %v873_v0, %v7020_v39  ;;  %v769_v36 = vpop.permute.xlu1 %768  ;;  %v761_v40 = vpop.permute.xlu0 %760 }
 0x1c5   :  { %v1108_v9 = vcombine.low %v1083_v5, %v1091_v6  ;;  %v1109_v37 = vcombine.high %v1083_v5, %v1091_v6  ;;  %v1124_v23 = vcombine.low %v1099_v7, %v1107_v8  ;;  %v1125_v38 = vcombine.high %v1099_v7, %v1107_v8 }
 0x1c6   :  { %v904_v41 = vcombine.low %v880_v17, %v896_v14  ;;  %v905_v55 = vcombine.high %v880_v17, %v896_v14  ;;  %v920_v56 = vcombine.low %v887_v22, %v903_v15  ;;  %v921_v58 = vcombine.high %v887_v22, %v903_v15 }
 0x1c7   :  { %v1116_v59 = vrot.slane %v1108_v9, %v7045_v57  ;;  %v1132_v60 = vrot.slane %v1124_v23, %v7045_v57  ;;  %v1123_v61 = vrot.slane %v1109_v37, %v7045_v57  ;;  %v1139_v62 = vrot.slane %v1125_v38, %v7045_v57 }
 0x1c8   :  { %v912_v63 = vrot.slane %v904_v41, %v7045_v57  ;;  %v919_v0 = vrot.slane %v905_v55, %v7045_v57  ;;  %v928_v5 = vrot.slane %v920_v56, %v7045_v57  ;;  %v935_v6 = vrot.slane %v921_v58, %v7045_v57  ;;  %v785_v7 = vpop.permute.xlu1 %784  ;;  %v777_v15 = vpop.permute.xlu0 %776 }
 0x1c9   :  { %v956_v8 = vcombine.low %v769_v36, %v785_v7  ;;  %v957_v14 = vcombine.high %v769_v36, %v785_v7  ;;  %v1140_v17 = vcombine.low %v1116_v59, %v1132_v60  ;;  %v1141_v22 = vcombine.high %v1116_v59, %v1132_v60 }
 0x1ca   :  { %v1144_v9 = vcombine.low %v912_v63, %v919_v0  ;;  %v6230_v23 = vcombine.high %v912_v63, %v919_v0  ;;  %v1160_v32 = vcombine.low %v928_v5, %v935_v6  ;;  %v6231_v37 = vcombine.high %v928_v5, %v935_v6 }
 0x1cb   :  { %v964_v38 = vrot.slane %v956_v8, %v7020_v39  ;;  %v971_v41 = vrot.slane %v957_v14, %v7020_v39  ;;  %v940_v54 = vcombine.low %v761_v40, %v777_v15  ;;  %v941_v55 = vcombine.high %v761_v40, %v777_v15  ;;  %6438 = vmatpush3.xpose.msk.msra.mxu0 %vm1940_vm2, %v1140_v17 }
 0x1cc   :  { %v7205_v56 = vrot.slane %v1144_v9, %v7020_v39  ;;  %v7208_v36 = vrot.slane %v6230_v23, %v7020_v39  ;;  %v7211_v58 = vrot.slane %v1160_v32, %v7020_v39  ;;  %v7214_v59 = vrot.slane %v6231_v37, %v7020_v39  ;;  %6443 = vmatpush3.xpose.msk.msra.mxu1 %vm1940_vm2, %v1141_v22  ;;  %v771_v60 = vpop.permute.xlu1 %770  ;;  %v763_v0 = vpop.permute.xlu0 %762 }
 0x1cd   :  { %v948_v63 = vrot.slane %v940_v54, %v7020_v39  ;;  %v955_v40 = vrot.slane %v941_v55, %v7020_v39  ;;  %6447 = vmatprep.subr.mxu1 %v6792_v27  ;;  %6452 = vmatprep.subr.mxu0 %v6792_v27  ;;  %v1142_v5 = vcombine.low %v1123_v61, %v1139_v62 }
 0x1ce   :  { %v1176_v32 = vcombine.low %v7205_v56, %v7208_v36  ;;  %v1177_v6 = vcombine.high %v7205_v56, %v7208_v36  ;;  %v1192_v7 = vcombine.low %v7211_v58, %v7214_v59  ;;  %v1193_v54 = vcombine.high %v7211_v58, %v7214_v59  ;;  %6440 = vmatmul.mubr.msk.f32.vlgmr.msra.gmra.mxu0 %vm1940_vm2, %v548_v43 }
 0x1cf   :  { %v972_v8 = vcombine.low %v948_v63, %v964_v38  ;;  %v973_v14 = vcombine.high %v948_v63, %v964_v38  ;;  %v988_v15 = vcombine.low %v955_v40, %v971_v41  ;;  %v989_v17 = vcombine.high %v955_v40, %v971_v41  ;;  %6445 = vmatmul.mubr.msk.f32.vlgmr.msra.gmra.mxu1 %vm1940_vm2, %v549_v44 }
 0x1d0   :  { %6448 = vmatpush3.xpose.msk.msra.mxu1 %vm1940_vm2, %v1142_v5  ;;  %v1143_v22 = vcombine.high %v1123_v61, %v1139_v62  ;;  %v787_v9 = vpop.permute.xlu1 %786  ;;  %6449 = vmatprep.mubr.msk.f32.mxu1 %vm6793_vm1, %v6792_v27  ;;  %v1184_v23 = vrot.slane %v1176_v32, %v7045_v57  ;;  %v1200_v43 = vrot.slane %v1192_v7, %v7045_v57  ;;  %v779_v19 = vpop.permute.xlu0 %778 }
 0x1d1   :  { %v980_v37 = vrot.slane %v972_v8, %v7045_v57  ;;  %v987_v38 = vrot.slane %v973_v14, %v7045_v57  ;;  %v996_v41 = vrot.slane %v988_v15, %v7045_v57  ;;  %v1003_v18 = vrot.slane %v989_v17, %v7045_v57  ;;  %6454 = vmatprep.mubr.msk.f32.mxu0 %vm6793_vm1, %v6792_v27 }
 0x1d2   :  { %6453 = vmatpush3.xpose.msk.msra.mxu0 %vm1940_vm2, %v1143_v22  ;;  %v1024_v44 = vcombine.low %v771_v60, %v787_v9  ;;  %v1025_v61 = vcombine.high %v771_v60, %v787_v9  ;;  %v1008_v62 = vcombine.low %v763_v0, %v779_v19  ;;  %v1009_v55 = vcombine.high %v763_v0, %v779_v19 }
 0x1d3   :  { %v1212_v56 = vcombine.low %v980_v37, %v987_v38  ;;  %v6232_v36 = vcombine.high %v980_v37, %v987_v38  ;;  %v1228_v58 = vcombine.low %v996_v41, %v1003_v18  ;;  %v6233_v59 = vcombine.high %v996_v41, %v1003_v18  ;;  %6450 = vmatmul.mubr.msk.f32.vlgmr.msra.gmra.mxu1 %vm1940_vm2, %v550_v45 }
 0x1d4   :  { %v1032_v63 = vrot.slane %v1024_v44, %v7020_v39  ;;  %v1039_v40 = vrot.slane %v1025_v61, %v7020_v39  ;;  %v1016_v5 = vrot.slane %v1008_v62, %v7020_v39  ;;  %v1023_v32 = vrot.slane %v1009_v55, %v7020_v39  ;;  %6457 = vmatprep.subr.mxu1 %v6792_v27  ;;  %v7258_v60 = vpop.permute.xlu1 %1348 }
 0x1d5   :  { %v1219_v0 = vrot.slane %v1212_v56, %v7020_v39  ;;  %v1227_v7 = vrot.slane %v6232_v36, %v7020_v39  ;;  %v7263_v8 = vrot.slane %v1228_v58, %v7020_v39  ;;  %v1243_v45 = vrot.slane %v6233_v59, %v7020_v39  ;;  %6455 = vmatmul.mubr.msk.f32.vlgmr.msra.gmra.mxu0 %vm1940_vm2, %v551_v50 }
 0x1d6   :  { %v1040_v14 = vcombine.low %v1016_v5, %v1032_v63  ;;  %v1041_v15 = vcombine.high %v1016_v5, %v1032_v63  ;;  %v1056_v17 = vcombine.low %v1023_v32, %v1039_v40  ;;  %v1057_v22 = vcombine.high %v1023_v32, %v1039_v40  ;;  %6462 = vmatprep.subr.mxu0 %v6792_v27 }
 0x1d7   :  { %v1244_v9 = vcombine.low %v1219_v0, %v1227_v7  ;;  %v1245_v37 = vcombine.high %v1219_v0, %v1227_v7  ;;  %v1260_v38 = vcombine.low %v7263_v8, %v1243_v45  ;;  %6459 = vmatprep.mubr.msk.f32.mxu1 %vm6793_vm1, %v6792_v27  ;;  %v755_v41 = vcombine.high %v7160_v12, %v7163_v13 }
 0x1d8   :  { %v1048_v20 = vrot.slane %v1040_v14, %v7045_v57  ;;  %v1055_v21 = vrot.slane %v1041_v15, %v7045_v57  ;;  %v1064_v50 = vrot.slane %v1056_v17, %v7045_v57  ;;  %v1071_v18 = vrot.slane %v1057_v22, %v7045_v57  ;;  %6464 = vmatprep.mubr.msk.f32.mxu0 %vm6793_vm1, %v6792_v27  ;;  %v1365_v19 = vpop.permute.xlu1 %1364 }
 0x1d9   :  { %v1208_v44 = vcombine.low %v1184_v23, %v1200_v43  ;;  %v1209_v61 = vcombine.high %v1184_v23, %v1200_v43  ;;  %v1191_v62 = vrot.slane %v1177_v6, %v7045_v57  ;;  %v1207_v55 = vrot.slane %v1193_v54, %v7045_v57 }
 0x1da   :  { %v1280_v56 = vcombine.low %v1048_v20, %v1055_v21  ;;  %v6234_v36 = vcombine.high %v1048_v20, %v1055_v21  ;;  %v1296_v58 = vcombine.low %v1064_v50, %v1071_v18  ;;  %v6235_v59 = vcombine.high %v1064_v50, %v1071_v18  ;;  %v1357_v21 = vpop.permute.xlu0 %1356 }
 0x1db   :  { %v1261_v63 = vcombine.high %v7263_v8, %v1243_v45  ;;  %6458 = vmatpush3.xpose.msk.msra.mxu1 %vm1940_vm2, %v1208_v44  ;;  %6463 = vmatpush3.xpose.msk.msra.mxu0 %vm1940_vm2, %v1209_v61  ;;  %v1210_v40 = vcombine.low %v1191_v62, %v1207_v55  ;;  %v1396_v5 = vcombine.low %v7258_v60, %v1365_v19 }
 0x1dc   :  { %v1287_v32 = vrot.slane %v1280_v56, %v7020_v39  ;;  %v1295_v23 = vrot.slane %v6234_v36, %v7020_v39  ;;  %v1303_v6 = vrot.slane %v1296_v58, %v7020_v39  ;;  %v1311_v54 = vrot.slane %v6235_v59, %v7020_v39  ;;  %6467 = vmatprep.subr.mxu1 %v6792_v27  ;;  %v1373_v43 = vpop.permute.xlu1 %1372 }
 0x1dd   :  { %6472 = vmatprep.subr.mxu0 %v6792_v27  ;;  %v1211_v0 = vcombine.high %v1191_v62, %v1207_v55  ;;  %v1397_v7 = vcombine.high %v7258_v60, %v1365_v19  ;;  %v1252_v8 = vrot.slane %v1244_v9, %v7045_v57  ;;  %v1268_v45 = vrot.slane %v1260_v38, %v7045_v57 }
 0x1de   :  { %v1312_v14 = vcombine.low %v1287_v32, %v1295_v23  ;;  %v1313_v15 = vcombine.high %v1287_v32, %v1295_v23  ;;  %v1328_v17 = vcombine.low %v1303_v6, %v1311_v54  ;;  %6460 = vmatmul.mubr.msk.f32.vlgmr.msra.gmra.mxu1 %vm1940_vm2, %v616_v51  ;;  %v1404_v22 = vrot.slane %v1396_v5, %v7020_v39 }
 0x1df   :  { %v1329_v20 = vcombine.high %v1303_v6, %v1311_v54  ;;  %6465 = vmatmul.mubr.msk.f32.vlgmr.msra.gmra.mxu0 %vm1940_vm2, %v617_v1  ;;  %6468 = vmatpush3.xpose.msk.msra.mxu1 %vm1940_vm2, %v1210_v40  ;;  %v1276_v60 = vcombine.low %v1252_v8, %v1268_v45  ;;  %v1277_v9 = vcombine.high %v1252_v8, %v1268_v45 }
 0x1e0   :  { %6473 = vmatpush3.xpose.msk.msra.mxu0 %vm1940_vm2, %v1211_v0  ;;  %6469 = vmatprep.mubr.msk.f32.mxu1 %vm6793_vm1, %v6792_v27  ;;  %v1412_v38 = vcombine.low %v1357_v21, %v1373_v43  ;;  %v1413_v51 = vcombine.high %v1357_v21, %v1373_v43  ;;  %v1259_v50 = vrot.slane %v1245_v37, %v7045_v57  ;;  %v1351_v18 = vpop.permute.xlu1 %1350  ;;  %v1359_v43 = vpop.permute.xlu0 %1358 }
 0x1e1   :  { %6474 = vmatprep.mubr.msk.f32.mxu0 %vm6793_vm1, %v6792_v27  ;;  %6477 = vmatprep.subr.mxu1 %v6792_v27  ;;  %v1275_v30 = vrot.slane %v1261_v63, %v7045_v57  ;;  %v7316_v31 = vrot.slane %v1312_v14, %v7045_v57  ;;  %v7319_v1 = vrot.slane %v1328_v17, %v7045_v57 }
 0x1e2   :  { %v1411_v19 = vrot.slane %v1397_v7, %v7020_v39  ;;  %6470 = vmatmul.mubr.msk.f32.vlgmr.msra.gmra.mxu1 %vm1940_vm2, %v618_v2  ;;  %6482 = vmatprep.subr.mxu0 %v6792_v27  ;;  %v1420_v37 = vrot.slane %v1412_v38, %v7020_v39  ;;  %v1427_v44 = vrot.slane %v1413_v51, %v7020_v39 }
 0x1e3   :  { %6475 = vmatmul.mubr.msk.f32.vlgmr.msra.gmra.mxu0 %vm1940_vm2, %v619_v24  ;;  %6478 = vmatpush3.xpose.msk.msra.mxu1 %vm1940_vm2, %v1276_v60  ;;  %v1278_v61 = vcombine.low %v1259_v50, %v1275_v30  ;;  %v1279_v62 = vcombine.high %v1259_v50, %v1275_v30  ;;  %v7335_v55 = vrot.slane %v1313_v15, %v7045_v57 }
 0x1e4   :  { %6483 = vmatpush3.xpose.msk.msra.mxu0 %vm1940_vm2, %v1277_v9  ;;  %v1428_v2 = vcombine.low %v1404_v22, %v1420_v37  ;;  %v1429_v56 = vcombine.high %v1404_v22, %v1420_v37  ;;  %v1444_v36 = vcombine.low %v1411_v19, %v1427_v44  ;;  %v1445_v58 = vcombine.high %v1411_v19, %v1427_v44  ;;  %v1367_v59 = vpop.permute.xlu1 %1366 }
 0x1e5   :  { %6479 = vmatprep.mubr.msk.f32.mxu1 %vm6793_vm1, %v6792_v27  ;;  %6484 = vmatprep.mubr.msk.f32.mxu0 %vm6793_vm1, %v6792_v27  ;;  %v1344_v46 = vcombine.low %v7316_v31, %v7319_v1  ;;  %v1464_v47 = vcombine.low %v1351_v18, %v1367_v59  ;;  %v1465_v24 = vcombine.high %v1351_v18, %v1367_v59 }
 0x1e6   :  { %v1436_v63 = vrot.slane %v1428_v2, %v7045_v57  ;;  %v1443_v40 = vrot.slane %v1429_v56, %v7045_v57  ;;  %v1452_v5 = vrot.slane %v1444_v36, %v7045_v57  ;;  %v1459_v32 = vrot.slane %v1445_v58, %v7045_v57  ;;  %6480 = vmatmul.mubr.msk.f32.vlgmr.msra.gmra.mxu1 %vm1940_vm2, %v684_v25 }
 0x1e7   :  { %6485 = vmatmul.mubr.msk.f32.vlgmr.msra.gmra.mxu0 %vm1940_vm2, %v685_v33  ;;  %6487 = vmatprep.subr.mxu1 %v6792_v27  ;;  %v1345_v23 = vcombine.high %v7316_v31, %v7319_v1  ;;  %v1472_v6 = vrot.slane %v1464_v47, %v7020_v39  ;;  %v1343_v54 = vrot.slane %v1329_v20, %v7045_v57 }
 0x1e8   :  { %v1668_v0 = vcombine.low %v1436_v63, %v1443_v40  ;;  %v6236_v7 = vcombine.high %v1436_v63, %v1443_v40  ;;  %v1684_v8 = vcombine.low %v1452_v5, %v1459_v32  ;;  %v6237_v45 = vcombine.high %v1452_v5, %v1459_v32  ;;  %6492 = vmatprep.subr.mxu0 %v6792_v27  ;;  %v1375_v25 = vpop.permute.xlu1 %1374 }
 0x1e9   :  { %6488 = vmatpush3.xpose.msk.msra.mxu1 %vm1940_vm2, %v1278_v61  ;;  %6493 = vmatpush3.xpose.msk.msra.mxu0 %vm1940_vm2, %v1279_v62  ;;  %v1479_v52 = vrot.slane %v1465_v24, %v7020_v39  ;;  %v1346_v3 = vcombine.low %v7335_v55, %v1343_v54  ;;  %v1480_v33 = vcombine.low %v1359_v43, %v1375_v25 }
 0x1ea   :  { %v1675_v14 = vrot.slane %v1668_v0, %v7020_v39  ;;  %v1683_v15 = vrot.slane %v6236_v7, %v7020_v39  ;;  %v7369_v17 = vrot.slane %v1684_v8, %v7020_v39  ;;  %v7372_v22 = vrot.slane %v6237_v45, %v7020_v39  ;;  %6489 = vmatprep.mubr.msk.f32.mxu1 %vm6793_vm1, %v6792_v27 }
 0x1eb   :  { %6494 = vmatprep.mubr.msk.f32.mxu0 %vm6793_vm1, %v6792_v27  ;;  %6497 = vmatprep.subr.mxu1 %v6792_v27  ;;  %v1347_v20 = vcombine.high %v7335_v55, %v1343_v54  ;;  %v1481_v21 = vcombine.high %v1359_v43, %v1375_v25  ;;  %v1488_v60 = vrot.slane %v1480_v33, %v7020_v39 }
 0x1ec   :  { %6490 = vmatmul.mubr.msk.f32.vlgmr.msra.gmra.mxu1 %vm1940_vm2, %v686_v35  ;;  %6495 = vmatmul.mubr.msk.f32.vlgmr.msra.gmra.mxu0 %vm1940_vm2, %v687_v42  ;;  %v1353_v9 = vpop.permute.xlu1 %1352  ;;  %v1700_v38 = vcombine.low %v1675_v14, %v1683_v15  ;;  %v1716_v51 = vcombine.low %v7369_v17, %v7372_v22  ;;  %v1701_v50 = vcombine.high %v1675_v14, %v1683_v15 }
 0x1ed   :  { %6502 = vmatprep.subr.mxu0 %v6792_v27  ;;  %6498 = vmatpush3.xpose.msk.msra.mxu1 %vm1940_vm2, %v1344_v46  ;;  %v1495_v18 = vrot.slane %v1481_v21, %v7020_v39  ;;  %v1496_v30 = vcombine.low %v1472_v6, %v1488_v60  ;;  %v1497_v31 = vcombine.high %v1472_v6, %v1488_v60 }
 0x1ee   :  { %6503 = vmatpush3.xpose.msk.msra.mxu0 %vm1940_vm2, %v1345_v23  ;;  %6499 = vmatprep.mubr.msk.f32.mxu1 %vm6793_vm1, %v6792_v27  ;;  %v1708_v53 = vrot.slane %v1700_v38, %v7045_v57  ;;  %v1724_v4 = vrot.slane %v1716_v51, %v7045_v57  ;;  %v7400_v35 = vrot.slane %v1701_v50, %v7045_v57 }
 0x1ef   :  { %6504 = vmatprep.mubr.msk.f32.mxu0 %vm6793_vm1, %v6792_v27  ;;  %6507 = vmatprep.subr.mxu1 %v6792_v27  ;;  %v1504_v42 = vrot.slane %v1496_v30, %v7045_v57  ;;  %v1511_v1 = vrot.slane %v1497_v31, %v7045_v57  ;;  %v1512_v19 = vcombine.low %v1479_v52, %v1495_v18 }
 0x1f0   :  { %6500 = vmatmul.mubr.msk.f32.vlgmr.msra.gmra.mxu1 %vm1940_vm2, %v752_v48  ;;  %6512 = vmatprep.subr.mxu0 %v6792_v27  ;;  %v1513_v37 = vcombine.high %v1479_v52, %v1495_v18  ;;  %v1732_v44 = vcombine.low %v1708_v53, %v1724_v4  ;;  %v1733_v61 = vcombine.high %v1708_v53, %v1724_v4  ;;  %v1369_v62 = vpop.permute.xlu1 %1368 }
 0x1f1   :  { %6505 = vmatmul.mubr.msk.f32.vlgmr.msra.gmra.mxu0 %vm1940_vm2, %v753_v49  ;;  %6508 = vmatpush3.xpose.msk.msra.mxu1 %vm1940_vm2, %v1346_v3  ;;  %v1520_v55 = vrot.slane %v1512_v19, %v7045_v57  ;;  %v1736_v2 = vcombine.low %v1504_v42, %v1511_v1  ;;  %v6238_v56 = vcombine.high %v1504_v42, %v1511_v1  ;;  %v1361_v49 = vpop.permute.xlu0 %1360 }
 0x1f2   :  { %6513 = vmatpush3.xpose.msk.msra.mxu0 %vm1940_vm2, %v1347_v20  ;;  %v1527_v48 = vrot.slane %v1513_v37, %v7045_v57  ;;  %6509 = vmatprep.mubr.msk.f32.mxu1 %vm6793_vm1, %v6792_v27  ;;  %v1532_v36 = vcombine.low %v1353_v9, %v1369_v62  ;;  %v1533_v58 = vcombine.high %v1353_v9, %v1369_v62 }
 0x1f3   :  { %v1743_v59 = vrot.slane %v1736_v2, %v7020_v39  ;;  %v1751_v10 = vrot.slane %v6238_v56, %v7020_v39  ;;  %6514 = vmatprep.mubr.msk.f32.mxu0 %vm6793_vm1, %v6792_v27  ;;  %6517 = vmatprep.subr.mxu1 %v6792_v27  ;;  %v1717_v11 = vcombine.high %v7369_v17, %v7372_v22 }
 0x1f4   :  { %v1752_v46 = vcombine.low %v1520_v55, %v1527_v48  ;;  %v6239_v47 = vcombine.high %v1520_v55, %v1527_v48  ;;  %v8270_v24 = vcombine.low %v7160_v12, %v7163_v13  ;;  %6522 = vmatprep.subr.mxu0 %v6792_v27  ;;  %v1540_v63 = vrot.slane %v1532_v36, %v7020_v39  ;;  %v1377_v40 = vpop.permute.xlu1 %1376 }
 0x1f5   :  { %6515 = vmatmul.mubr.msk.f32.vlgmr.msra.gmra.mxu0 %vm1940_vm2, %v755_v41  ;;  %v1547_v5 = vrot.slane %v1533_v58, %v7020_v39  ;;  %v1548_v32 = vcombine.low %v1361_v49, %v1377_v40  ;;  %v1549_v23 = vcombine.high %v1361_v49, %v1377_v40  ;;  %v7445_v43 = vrot.slane %v1717_v11, %v7045_v57 }
 0x1f6   :  { %6510 = vmatmul.mubr.msk.f32.vlgmr.msra.gmra.mxu1 %vm1940_vm2, %v8270_v24  ;;  %v1759_v6 = vrot.slane %v1752_v46, %v7020_v39  ;;  %v1767_v54 = vrot.slane %v6239_v47, %v7020_v39  ;;  %6523 = vmatpush3.msra.mxu0 %v1733_v61  ;;  %v1768_v41 = vcombine.low %v1743_v59, %v1751_v10  ;;  %v55_v46 = vld [vmem:[%s8254_s1] sm:$0x1] }
 0x1f7   :  { %6518 = vmatpush3.msra.mxu1 %v1732_v44  ;;  %6519 = vmatprep.mubr.msk.f32.mxu1 %vm6793_vm1, %v6792_v27  ;;  %v1556_v12 = vrot.slane %v1548_v32, %v7020_v39  ;;  %v1563_v13 = vrot.slane %v1549_v23, %v7020_v39  ;;  %v1734_v0 = vcombine.low %v7400_v35, %v7445_v43  ;;  %v6276_v47 = vadd.f32 -1.0, %v55_v46 }
 0x1f8   :  { %6524 = vmatprep.mubr.msk.f32.mxu0 %vm6793_vm1, %v6792_v27  ;;  %6527 = vmatprep.subr.mxu1 %v6792_v27  ;;  %v1735_v7 = vcombine.high %v7400_v35, %v7445_v43  ;;  %v1784_v8 = vcombine.low %v1759_v6, %v1767_v54  ;;  %v1769_v45 = vcombine.high %v1743_v59, %v1751_v10 }
 0x1f9   :  { %6532 = vmatprep.subr.mxu0 %v6792_v27  ;;  %v1564_v25 = vcombine.low %v1540_v63, %v1556_v12  ;;  %v1565_v52 = vcombine.high %v1540_v63, %v1556_v12  ;;  %v1580_v3 = vcombine.low %v1547_v5, %v1563_v13  ;;  %v1581_v33 = vcombine.high %v1547_v5, %v1563_v13 }
 0x1fa   :  { %v7458_v14 = vrot.slane %v1768_v41, %v7045_v57  ;;  %v7461_v15 = vrot.slane %v1784_v8, %v7045_v57  ;;  %v7464_v17 = vrot.slane %v1769_v45, %v7045_v57  ;;  %v1785_v22 = vcombine.high %v1759_v6, %v1767_v54  ;;  %v56_v8 = vld [vmem:[%s8254_s1 + $0x1] sm:$0x1] }
 0x1fb   :  { %v1572_v20 = vrot.slane %v1564_v25, %v7045_v57  ;;  %v1579_v21 = vrot.slane %v1565_v52, %v7045_v57  ;;  %v1588_v60 = vrot.slane %v1580_v3, %v7045_v57  ;;  %v1595_v9 = vrot.slane %v1581_v33, %v7045_v57 }
 0x1fc   :  { %v1800_v38 = vcombine.low %v7458_v14, %v7461_v15  ;;  %v1801_v51 = vcombine.high %v7458_v14, %v7461_v15  ;;  %v7475_v50 = vrot.slane %v1785_v22, %v7045_v57  ;;  %v3177_v24 = vmul.f32 1e+30, %v6276_v47 }
 0x1fd   :  { %v1804_v18 = vcombine.low %v1572_v20, %v1579_v21  ;;  %v6240_v30 = vcombine.high %v1572_v20, %v1579_v21  ;;  %v1820_v31 = vcombine.low %v1588_v60, %v1595_v9  ;;  %v6241_v53 = vcombine.high %v1588_v60, %v1595_v9 }
 0x1fe   :  { %v1802_v4 = vcombine.low %v7464_v17, %v7475_v50  ;;  %v1803_v42 = vcombine.high %v7464_v17, %v7475_v50  ;;  %v7509_v63 = vsub.s32 0, %v7015_v34  ;;  %v6277_v20 = vadd.f32 -1.0, %v56_v8 }
 0x1ff   :  { %v1811_v1 = vrot.slane %v1804_v18, %v7020_v39  ;;  %v1819_v19 = vrot.slane %v6240_v30, %v7020_v39  ;;  %v1827_v37 = vrot.slane %v1820_v31, %v7020_v39  ;;  %v1835_v44 = vrot.slane %v6241_v53, %v7020_v39  ;;  %v57_v53 = vld [vmem:[%s8254_s1 + $0x2] sm:$0x1] }
 0x200   :  { %v3188_v40 = vrot.slane %v3177_v24, %v7509_v63  ;;  %v3178_v31 = vmul.f32 1e+30, %v6277_v20 }
 0x201   :  { %v1836_v61 = vcombine.low %v1811_v1, %v1819_v19  ;;  %v1852_v62 = vcombine.low %v1827_v37, %v1835_v44  ;;  %v1837_v55 = vcombine.high %v1811_v1, %v1819_v19  ;;  %v1853_v2 = vcombine.high %v1827_v37, %v1835_v44 }
 0x202   :  { %v3192_v19 = vrot.slane %v3178_v31, %v7509_v63  ;;  %v6278_v37 = vadd.f32 -1.0, %v57_v53 }
 0x203   :  { %v7486_v56 = vrot.slane %v1836_v61, %v7045_v57  ;;  %v7489_v48 = vrot.slane %v1852_v62, %v7045_v57  ;;  %v7492_v36 = vrot.slane %v1837_v55, %v7045_v57  ;;  %v7495_v58 = vrot.slane %v1853_v2, %v7045_v57 }
 0x204   :  { %v3179_v24 = vmul.f32 1e+30, %v6278_v37 }
 0x205   :  { %v1868_v59 = vcombine.low %v7486_v56, %v7489_v48  ;;  %v1869_v10 = vcombine.high %v7486_v56, %v7489_v48  ;;  %v1870_v11 = vcombine.low %v7492_v36, %v7495_v58  ;;  %v1871_v49 = vcombine.high %v7492_v36, %v7495_v58 }
 0x28e   :  { %v2013_v5 = vpop.f32.mrf.mxu0 }
 0x28f   :  { %v3157_v32 = vmul.f32 0.35355338, %v2013_v5  ;;  %v2089_v23 = vpop.f32.mrf.mxu1 }
 0x290   :  { %v3158_v6 = vmul.f32 0.35355338, %v2089_v23  ;;  %v6441_v54 = vpop.f32.mrf.mxu0 }
 0x291   :  { %v6446_v12 = vpop.f32.mrf.mxu1  ;;  %v7512_v13 = vadd.f32 %v3188_v40, %v3157_v32 }
 0x292   :  { %v7514_v41 = vadd.f32 %v3188_v40, %v3158_v6 }
 0x293   :  { %v2165_v45 = vpop.f32.mrf.mxu1  ;;  %v3221_v25 = vsel %vm1940_vm2, %v7512_v13, -inf }
 0x294   :  { %v3159_v52 = vmul.f32 0.35355338, %v2165_v45  ;;  %v3224_v3 = vsel %vm1940_vm2, %v7514_v41, -inf  ;;  %3222 = vmax.xlane.f32.xlu0 %v3221_v25  ;;  %v58_v45 = vld [vmem:[%s8254_s1 + $0x3] sm:$0x1]  ;;  %s6797_s1 = smov 8  }
 0x295   :  { %v2241_v33 = vpop.f32.mrf.mxu0  ;;  %3225 = vmax.xlane.f32.xlu1 %v3224_v3  ;;  %v6451_v22 = vpop.f32.mrf.mxu1  ;;  %v3196_v3 = vrot.slane %v3179_v24, %v7509_v63 }
 0x296   :  { %v3160_v21 = vmul.f32 0.35355338, %v2241_v33  ;;  %v7523_v60 = vadd.f32 %v3188_v40, %v3159_v52 }
 0x297   :  { %v6456_v9 = vpop.f32.mrf.mxu0 }
 0x298   :  { %v3227_v18 = vsel %vm1940_vm2, %v7523_v60, -inf  ;;  %v7527_v30 = vadd.f32 %v3188_v40, %v3160_v21 }
 0x299   :  { %3228 = vmax.xlane.f32.xlu0 %v3227_v18  ;;  %v6279_v18 = vadd.f32 -1.0, %v58_v45 }
 0x29a   :  { %v3230_v1 = vsel %vm1940_vm2, %v7527_v30, -inf }
 0x29d   :  { %3231 = vmax.xlane.f32.xlu0 %v3230_v1 }
 0x29e   :  { %v2317_v44 = vpop.f32.mrf.mxu1 }
 0x29f   :  { %v3161_v61 = vmul.f32 0.35355338, %v2317_v44  ;;  %v2393_v62 = vpop.f32.mrf.mxu0 }
 0x2a0   :  { %v3162_v55 = vmul.f32 0.35355338, %v2393_v62  ;;  %v6461_v2 = vpop.f32.mrf.mxu1  ;;  %v3180_v62 = vmul.f32 1e+30, %v6279_v18 }
 0x2a1   :  { %v6466_v46 = vpop.f32.mrf.mxu0  ;;  %v7535_v47 = vadd.f32 %v3192_v19, %v3161_v61 }
 0x2a2   :  { %v2469_v40 = vpop.f32.mrf.mxu1  ;;  %v7537_v5 = vadd.f32 %v3192_v19, %v3162_v55 }
 0x2a3   :  { %v3163_v32 = vmul.f32 0.35355338, %v2469_v40  ;;  %v2545_v23 = vpop.f32.mrf.mxu0  ;;  %v3233_v6 = vsel %vm1940_vm2, %v7535_v47, -inf }
 0x2a4   :  { %v3164_v54 = vmul.f32 0.35355338, %v2545_v23  ;;  %3234 = vmax.xlane.f32.xlu1 %v3233_v6  ;;  %v6471_v12 = vpop.f32.mrf.mxu1  ;;  %v3236_v8 = vsel %vm1940_vm2, %v7537_v5, -inf }
 0x2a5   :  { %v6476_v25 = vpop.f32.mrf.mxu0  ;;  %3237 = vmax.xlane.f32.xlu0 %v3236_v8  ;;  %v7546_v52 = vadd.f32 %v3192_v19, %v3163_v32  ;;  %v3200_v12 = vrot.slane %v3180_v62, %v7509_v63 }
 0x2a6   :  { %v2621_v33 = vpop.f32.mrf.mxu1  ;;  %v7549_v22 = vadd.f32 %v3192_v19, %v3164_v54 }
 0x2a7   :  { %v3165_v20 = vmul.f32 0.35355338, %v2621_v33  ;;  %v2697_v21 = vpop.f32.mrf.mxu0  ;;  %v3239_v9 = vsel %vm1940_vm2, %v7546_v52, -inf }
 0x2a8   :  { %v3166_v31 = vmul.f32 0.35355338, %v2697_v21  ;;  %3240 = vmax.xlane.f32.xlu1 %v3239_v9  ;;  %v6481_v53 = vpop.f32.mrf.mxu1  ;;  %v3242_v1 = vsel %vm1940_vm2, %v7549_v22, -inf }
 0x2a9   :  { %v6486_v37 = vpop.f32.mrf.mxu0  ;;  %3243 = vmax.xlane.f32.xlu0 %v3242_v1  ;;  %v7555_v44 = vadd.f32 %v3196_v3, %v3165_v20 }
 0x2aa   :  { %v7557_v61 = vadd.f32 %v3196_v3, %v3166_v31 }
 0x2ab   :  { %v3245_v19 = vsel %vm1940_vm2, %v7555_v44, -inf }
 0x2ac   :  { %v2773_v55 = vpop.f32.mrf.mxu1  ;;  %v2849_v2 = vpop.f32.mrf.mxu0  ;;  %3246 = vmax.xlane.f32.xlu1 %v3245_v19  ;;  %v3248_v46 = vsel %vm1940_vm2, %v7557_v61, -inf }
 0x2ad   :  { %v3167_v24 = vmul.f32 0.35355338, %v2773_v55  ;;  %v3168_v40 = vmul.f32 0.35355338, %v2849_v2  ;;  %3249 = vmax.xlane.f32.xlu0 %v3248_v46 }
 0x2ae   :  { %v6496_v32 = vpop.f32.mrf.mxu0  ;;  %v6491_v23 = vpop.f32.mrf.mxu1 }
 0x2af   :  { %v7563_v6 = vadd.f32 %v3196_v3, %v3167_v24  ;;  %v7565_v54 = vadd.f32 %v3196_v3, %v3168_v40 }
 0x2b0   :  { %v2925_v8 = vpop.f32.mrf.mxu1 }
 0x2b1   :  { %v3169_v45 = vmul.f32 0.35355338, %v2925_v8  ;;  %v3001_v25 = vpop.f32.mrf.mxu0  ;;  %v3251_v33 = vsel %vm1940_vm2, %v7563_v6, -inf  ;;  %v3254_v20 = vsel %vm1940_vm2, %v7565_v54, -inf }
 0x2b2   :  { %v3170_v21 = vmul.f32 0.35355338, %v3001_v25  ;;  %3252 = vmax.xlane.f32.xlu1 %v3251_v33  ;;  %v6501_v9 = vpop.f32.mrf.mxu1  ;;  %3255 = vmax.xlane.f32.xlu0 %v3254_v20 }
 0x2b3   :  { %v6506_v18 = vpop.f32.mrf.mxu0  ;;  %v7572_v31 = vadd.f32 %v3200_v12, %v3169_v45 }
 0x2b4   :  { %v7574_v53 = vadd.f32 %v3200_v12, %v3170_v21 }
 0x2b5   :  { %v3153_v1 = vpop.f32.mrf.mxu0  ;;  %v3257_v37 = vsel %vm1940_vm2, %v7572_v31, -inf }
 0x2b6   :  { %v3077_v3 = vpop.f32.mrf.mxu1  ;;  %v3172_v19 = vmul.f32 0.35355338, %v3153_v1  ;;  %3258 = vmax.xlane.f32.xlu1 %v3257_v37  ;;  %v3260_v55 = vsel %vm1940_vm2, %v7574_v53, -inf }
 0x2b7   :  { %v3171_v63 = vmul.f32 0.35355338, %v3077_v3  ;;  %v6516_v2 = vpop.f32.mrf.mxu0  ;;  %3261 = vmax.xlane.f32.xlu0 %v3260_v55 }
 0x2b8   :  { %v6511_v62 = vpop.f32.mrf.mxu1  ;;  %v7582_v24 = vadd.f32 %v3200_v12, %v3172_v19 }
 0x2b9   :  { %v7580_v46 = vadd.f32 %v3200_v12, %v3171_v63 }
 0x2ba   :  { %v3266_v32 = vsel %vm1940_vm2, %v7582_v24, -inf }
 0x2bb   :  { %v3263_v40 = vsel %vm1940_vm2, %v7580_v46, -inf  ;;  %3267 = vmax.xlane.f32.xlu0 %v3266_v32 }
 0x2bc   :  { %3264 = vmax.xlane.f32.xlu1 %v3263_v40 }
 0x2cd   :  { %1362 = vrot.lane.b32.xlu1 %v6970_v26, %s6794_s23 }
 0x2d1   :  { %1354 = vrot.lane.b32.xlu0 %v6928_v16, %s6794_s23 }
 0x31d   :  { %v3223_v23 = vpop.xlane.xlu0 %3222 }
 0x31e   :  { %v3226_v8 = vpop.xlane.xlu1 %3225  ;;  %v3269_v45 = vsub.f32 %v7512_v13, %v3223_v23 }
 0x31f   :  { %v3270_v12 = vsub.f32 %v7514_v41, %v3226_v8 }
 0x320   :  { %v3285_v25 = vmul.f32 1.442695, %v3269_v45 }
 0x321   :  { %v3287_v33 = vmul.f32 1.442695, %v3270_v12 }
 0x322   :  { %6666 = vpow2.f32 %v3285_v25  ;;  %v3229_v20 = vpop.xlane.xlu0 %3228 }
 0x323   :  { %6668 = vpow2.f32 %v3287_v33  ;;  %v3271_v21 = vsub.f32 %v7523_v60, %v3229_v20 }
 0x325   :  { %v3289_v9 = vmul.f32 1.442695, %v3271_v21 }
 0x326   :  { %v3232_v18 = vpop.xlane.xlu0 %3231 }
 0x327   :  { %6670 = vpow2.f32 %v3289_v9  ;;  %v3272_v26 = vsub.f32 %v7527_v30, %v3232_v18 }
 0x329   :  { %v3291_v3 = vmul.f32 1.442695, %v3272_v26 }
 0x32b   :  { %6672 = vpow2.f32 %v3291_v3 }
 0x32d   :  { %v3235_v16 = vpop.xlane.xlu1 %3234 }
 0x32e   :  { %v3273_v63 = vsub.f32 %v7535_v47, %v3235_v16  ;;  %v3238_v13 = vpop.xlane.xlu0 %3237 }
 0x32f   :  { %v7597_v1 = vpop.eup %6666  ;;  %v3274_v41 = vsub.f32 %v7537_v5, %v3238_v13 }
 0x330   :  { %v7600_v37 = vpop.eup %6668  ;;  %v3293_v19 = vmul.f32 1.442695, %v3273_v63  ;;  %v3317_v60 = vsel %vm1940_vm2, %v7597_v1, 0.0 }
 0x331   :  { %v3241_v62 = vpop.xlane.xlu1 %3240  ;;  %v3295_v55 = vmul.f32 1.442695, %v3274_v41  ;;  %v3320_v30 = vsel %vm1940_vm2, %v7600_v37, 0.0  ;;  %3318 = vadd.xlane.f32.xlu1 %v3317_v60 }
 0x332   :  { %6674 = vpow2.f32 %v3293_v19  ;;  %v3275_v47 = vsub.f32 %v7546_v52, %v3241_v62  ;;  %v3244_v2 = vpop.xlane.xlu0 %3243  ;;  %3321 = vadd.xlane.f32.xlu0 %v3320_v30 }
 0x333   :  { %6676 = vpow2.f32 %v3295_v55  ;;  %v3276_v5 = vsub.f32 %v7549_v22, %v3244_v2 }
 0x334   :  { %v7608_v40 = vpop.eup %6670  ;;  %v3297_v32 = vmul.f32 1.442695, %v3275_v47 }
 0x335   :  { %v3247_v23 = vpop.xlane.xlu1 %3246  ;;  %v3299_v8 = vmul.f32 1.442695, %v3276_v5  ;;  %v3323_v45 = vsel %vm1940_vm2, %v7608_v40, 0.0 }
 0x336   :  { %6678 = vpow2.f32 %v3297_v32  ;;  %v3277_v12 = vsub.f32 %v7555_v44, %v3247_v23  ;;  %v3250_v25 = vpop.xlane.xlu0 %3249  ;;  %3324 = vadd.xlane.f32.xlu1 %v3323_v45 }
 0x337   :  { %6680 = vpow2.f32 %v3299_v8  ;;  %v3278_v52 = vsub.f32 %v7557_v61, %v3250_v25 }
 0x338   :  { %v7614_v33 = vpop.eup %6672  ;;  %v3301_v20 = vmul.f32 1.442695, %v3277_v12 }
 0x339   :  { %v3303_v22 = vmul.f32 1.442695, %v3278_v52  ;;  %v3326_v21 = vsel %vm1940_vm2, %v7614_v33, 0.0 }
 0x33a   :  { %6682 = vpow2.f32 %v3301_v20  ;;  %3327 = vadd.xlane.f32.xlu0 %v3326_v21 }
 0x33b   :  { %v3253_v9 = vpop.xlane.xlu1 %3252  ;;  %v3256_v18 = vpop.xlane.xlu0 %3255  ;;  %6684 = vpow2.f32 %v3303_v22 }
 0x33c   :  { %v3279_v26 = vsub.f32 %v7563_v6, %v3253_v9  ;;  %v3280_v44 = vsub.f32 %v7565_v54, %v3256_v18 }
 0x33e   :  { %v3305_v3 = vmul.f32 1.442695, %v3279_v26  ;;  %v3307_v16 = vmul.f32 1.442695, %v3280_v44 }
 0x33f   :  { %v7620_v63 = vpop.eup %6674  ;;  %v3259_v61 = vpop.xlane.xlu1 %3258 }
 0x340   :  { %v7622_v13 = vpop.eup %6676  ;;  %6686 = vpow2.f32 %v3305_v3  ;;  %v3281_v41 = vsub.f32 %v7572_v31, %v3259_v61  ;;  %v3329_v19 = vsel %vm1940_vm2, %v7620_v63, 0.0  ;;  %v3262_v60 = vpop.xlane.xlu0 %3261 }
 0x341   :  { %6688 = vpow2.f32 %v3307_v16  ;;  %3330 = vadd.xlane.f32.xlu1 %v3329_v19  ;;  %v3282_v6 = vsub.f32 %v7574_v53, %v3262_v60  ;;  %v3332_v54 = vsel %vm1940_vm2, %v7622_v13, 0.0 }
 0x342   :  { %v3309_v62 = vmul.f32 1.442695, %v3281_v41  ;;  %3333 = vadd.xlane.f32.xlu0 %v3332_v54 }
 0x343   :  { %v7630_v55 = vpop.eup %6678  ;;  %v3311_v31 = vmul.f32 1.442695, %v3282_v6 }
 0x344   :  { %v7632_v47 = vpop.eup %6680  ;;  %6690 = vpow2.f32 %v3309_v62  ;;  %v3268_v2 = vpop.xlane.xlu0 %3267  ;;  %v3335_v53 = vsel %vm1940_vm2, %v7630_v55, 0.0 }
 0x345   :  { %v3265_v30 = vpop.xlane.xlu1 %3264  ;;  %v3284_v32 = vsub.f32 %v7582_v24, %v3268_v2  ;;  %v3338_v23 = vsel %vm1940_vm2, %v7632_v47, 0.0  ;;  %6692 = vpow2.f32 %v3311_v31 }
 0x346   :  { %v3283_v5 = vsub.f32 %v7580_v46, %v3265_v30  ;;  %3336 = vadd.xlane.f32.xlu0 %v3335_v53  ;;  %3339 = vadd.xlane.f32.xlu1 %v3338_v23 }
 0x347   :  { %v7640_v8 = vpop.eup %6682  ;;  %v3315_v45 = vmul.f32 1.442695, %v3284_v32 }
 0x348   :  { %v3313_v12 = vmul.f32 1.442695, %v3283_v5  ;;  %v3341_v25 = vsel %vm1940_vm2, %v7640_v8, 0.0  ;;  %v7644_v46 = vpop.eup %6684  ;;  %v7678_v60 = vpop.permute.xlu0 %1354 }
 0x349   :  { %6694 = vpow2.f32 %v3315_v45  ;;  %v3344_v52 = vsel %vm1940_vm2, %v7644_v46, 0.0  ;;  %v7676_v19 = vpop.permute.xlu1 %1362 }
 0x34a   :  { %3342 = vadd.xlane.f32.xlu0 %v3341_v25  ;;  %6696 = vpow2.f32 %v3313_v12 }
 0x34d   :  { %v7646_v24 = vpop.eup %6686 }
 0x34e   :  { %v7650_v20 = vpop.eup %6688  ;;  %3345 = vadd.xlane.f32.xlu0 %v3344_v52  ;;  %v3347_v9 = vsel %vm1940_vm2, %v7646_v24, 0.0 }
 0x34f   :  { %v3350_v22 = vsel %vm1940_vm2, %v7650_v20, 0.0 }
 0x350   :  { %3351 = vadd.xlane.f32.xlu1 %v3350_v22 }
 0x351   :  { %v7654_v21 = vpop.eup %6690 }
 0x352   :  { %3348 = vadd.xlane.f32.xlu0 %v3347_v9  ;;  %v7658_v18 = vpop.eup %6692  ;;  %v3353_v26 = vsel %vm1940_vm2, %v7654_v21, 0.0 }
 0x353   :  { %v3356_v16 = vsel %vm1940_vm2, %v7658_v18, 0.0 }
 0x356   :  { %v7662_v44 = vpop.eup %6694  ;;  %3354 = vadd.xlane.f32.xlu0 %v3353_v26 }
 0x357   :  { %v3362_v3 = vsel %vm1940_vm2, %v7662_v44, 0.0  ;;  %v7668_v61 = vpop.eup %6696 }
 0x358   :  { %3363 = vadd.xlane.f32.xlu1 %v3362_v3  ;;  %v3359_v41 = vsel %vm1940_vm2, %v7668_v61, 0.0 }
 0x35a   :  { %3357 = vadd.xlane.f32.xlu0 %v3356_v16 }
 0x35e   :  { %3360 = vadd.xlane.f32.xlu0 %v3359_v41 }
 0x369   :  { %1378 = vrot.lane.b32.xlu1 %v6984_v28, %s6794_s23 }
 0x374   :  { %1370 = vrot.lane.b32.xlu0 %v6986_v29, %s6794_s23 }
 0x3ba   :  { %v3319_v6 = vpop.xlane.xlu1 %3318 }
 0x3bb   :  { %6698 = vrcp.f32 %v3319_v6  ;;  %v3322_v54 = vpop.xlane.xlu0 %3321 }
 0x3bc   :  { %6700 = vrcp.f32 %v3322_v54 }
 0x3bf   :  { %v3325_v62 = vpop.xlane.xlu1 %3324 }
 0x3c0   :  { %6702 = vrcp.f32 %v3325_v62 }
 0x3c3   :  { %v3328_v30 = vpop.xlane.xlu0 %3327 }
 0x3c4   :  { %6704 = vrcp.f32 %v3328_v30 }
 0x3c8   :  { %v6699_v31 = vpop.eup %6698 }
 0x3c9   :  { %v6701_v2 = vpop.eup %6700  ;;  %v3381_v5 = vmul.f32 %v6699_v31, %v7597_v1 }
 0x3ca   :  { %v3331_v28 = vpop.xlane.xlu1 %3330  ;;  %v3382_v32 = vmul.f32 %v6701_v2, %v7600_v37 }
 0x3cb   :  { %6706 = vrcp.f32 %v3331_v28  ;;  %v3334_v29 = vpop.xlane.xlu0 %3333  ;;  %6520 = vmatmul.mubr.msk.f32.vlgmr.msra.gmra.mxu1 %vm1940_vm2, %v3381_v5 }
 0x3cc   :  { %6708 = vrcp.f32 %v3334_v29  ;;  %6525 = vmatmul.mubr.msk.f32.vlgmr.msra.gmra.mxu0 %vm1940_vm2, %v3382_v32  ;;  %6528 = vmatpush3.msra.mxu1 %v1734_v0 }
 0x3cd   :  { %v6703_v53 = vpop.eup %6702  ;;  %6533 = vmatpush3.msra.mxu0 %v1735_v7  ;;  %6529 = vmatprep.mubr.msk.f32.mxu1 %vm6793_vm1, %v6792_v27 }
 0x3ce   :  { %6537 = vmatprep.subr.mxu1 %v6792_v27  ;;  %v3383_v1 = vmul.f32 %v6703_v53, %v7608_v40  ;;  %6534 = vmatprep.mubr.msk.f32.mxu0 %vm6793_vm1, %v6792_v27 }
 0x3cf   :  { %v3340_v37 = vpop.xlane.xlu1 %3339  ;;  %v3337_v23 = vpop.xlane.xlu0 %3336  ;;  %6542 = vmatprep.subr.mxu0 %v6792_v27 }
 0x3d0   :  { %6710 = vrcp.f32 %v3340_v37  ;;  %6530 = vmatmul.mubr.msk.f32.vlgmr.msra.gmra.mxu1 %vm1940_vm2, %v3383_v1 }
 0x3d1   :  { %v6705_v0 = vpop.eup %6704  ;;  %6712 = vrcp.f32 %v3337_v23  ;;  %6538 = vmatpush3.msra.mxu1 %v1800_v38  ;;  %6539 = vmatprep.mubr.msk.f32.mxu1 %vm6793_vm1, %v6792_v27 }
 0x3d2   :  { %6547 = vmatprep.subr.mxu1 %v6792_v27  ;;  %v3384_v35 = vmul.f32 %v6705_v0, %v7614_v33 }
 0x3d3   :  { %v3343_v43 = vpop.xlane.xlu0 %3342 }
 0x3d4   :  { %6714 = vrcp.f32 %v3343_v43  ;;  %6535 = vmatmul.mubr.msk.f32.vlgmr.msra.gmra.mxu0 %vm1940_vm2, %v3384_v35 }
 0x3d5   :  { %6543 = vmatpush3.msra.mxu0 %v1801_v51  ;;  %6544 = vmatprep.mubr.msk.f32.mxu0 %vm6793_vm1, %v6792_v27 }
 0x3d6   :  { %6552 = vmatprep.subr.mxu0 %v6792_v27 }
 0x3d7   :  { %v3346_v7 = vpop.xlane.xlu0 %3345 }
 0x3d8   :  { %v6707_v38 = vpop.eup %6706  ;;  %6716 = vrcp.f32 %v3346_v7 }
 0x3d9   :  { %v6709_v40 = vpop.eup %6708  ;;  %v3352_v45 = vpop.xlane.xlu1 %3351  ;;  %v3385_v33 = vmul.f32 %v6707_v38, %v7620_v63 }
 0x3da   :  { %6718 = vrcp.f32 %v3352_v45  ;;  %v3386_v12 = vmul.f32 %v6709_v40, %v7622_v13 }
 0x3db   :  { %6540 = vmatmul.mubr.msk.f32.vlgmr.msra.gmra.mxu1 %vm1940_vm2, %v3385_v33  ;;  %v3349_v25 = vpop.xlane.xlu0 %3348 }
 0x3dc   :  { %6548 = vmatpush3.msra.mxu1 %v1802_v4  ;;  %6720 = vrcp.f32 %v3349_v25  ;;  %6545 = vmatmul.mubr.msk.f32.vlgmr.msra.gmra.mxu0 %vm1940_vm2, %v3386_v12 }
 0x3dd   :  { %v6711_v14 = vpop.eup %6710  ;;  %6553 = vmatpush3.msra.mxu0 %v1803_v42  ;;  %6549 = vmatprep.mubr.msk.f32.mxu1 %vm6793_vm1, %v6792_v27 }
 0x3de   :  { %v6713_v15 = vpop.eup %6712  ;;  %6557 = vmatprep.subr.mxu1 %v6792_v27  ;;  %6554 = vmatprep.mubr.msk.f32.mxu0 %vm6793_vm1, %v6792_v27  ;;  %v3388_v51 = vmul.f32 %v6711_v14, %v7632_v47 }
 0x3df   :  { %6562 = vmatprep.subr.mxu0 %v6792_v27  ;;  %v3355_v4 = vpop.xlane.xlu0 %3354  ;;  %v3387_v63 = vmul.f32 %v6713_v15, %v7630_v55 }
 0x3e0   :  { %6555 = vmatmul.mubr.msk.f32.vlgmr.msra.gmra.mxu0 %vm1940_vm2, %v3388_v51  ;;  %6722 = vrcp.f32 %v3355_v4 }
 0x3e1   :  { %v6715_v17 = vpop.eup %6714  ;;  %v3364_v50 = vpop.xlane.xlu1 %3363  ;;  %6550 = vmatmul.mubr.msk.f32.vlgmr.msra.gmra.mxu1 %vm1940_vm2, %v3387_v63  ;;  %6563 = vmatpush3.msra.mxu0 %v1869_v10 }
 0x3e2   :  { %6558 = vmatpush3.msra.mxu1 %v1868_v59  ;;  %6559 = vmatprep.mubr.msk.f32.mxu1 %vm6793_vm1, %v6792_v27  ;;  %v3389_v42 = vmul.f32 %v6715_v17, %v7640_v8 }
 0x3e3   :  { %6567 = vmatprep.subr.mxu1 %v6792_v27  ;;  %v3358_v13 = vpop.xlane.xlu0 %3357  ;;  %6564 = vmatprep.mubr.msk.f32.mxu0 %vm6793_vm1, %v6792_v27 }
 0x3e4   :  { %6572 = vmatprep.subr.mxu0 %v6792_v27  ;;  %6724 = vrcp.f32 %v3358_v13 }
 0x3e5   :  { %v6717_v55 = vpop.eup %6716  ;;  %6560 = vmatmul.mubr.msk.f32.vlgmr.msra.gmra.mxu1 %vm1940_vm2, %v3389_v42  ;;  %v1379_v59 = vpop.permute.xlu1 %1378  ;;  %6726 = vrcp.f32 %v3364_v50 }
 0x3e6   :  { %6568 = vmatpush3.msra.mxu1 %v1870_v11  ;;  %v3390_v56 = vmul.f32 %v6717_v55, %v7644_v46  ;;  %6569 = vmatprep.mubr.msk.f32.mxu1 %vm6793_vm1, %v6792_v27  ;;  %v1616_v11 = vcombine.low %v7676_v19, %v1379_v59  ;;  %v1617_v8 = vcombine.high %v7676_v19, %v1379_v59 }
 0x3e7   :  { %v6719_v48 = vpop.eup %6718  ;;  %v3361_v10 = vpop.xlane.xlu0 %3360  ;;  %6577 = vmatprep.subr.mxu1 %v6792_v27 }
 0x3e8   :  { %6565 = vmatmul.mubr.msk.f32.vlgmr.msra.gmra.mxu0 %vm1940_vm2, %v3390_v56  ;;  %v3392_v52 = vmul.f32 %v6719_v48, %v7650_v20  ;;  %v1624_v58 = vrot.slane %v1616_v11, %v7020_v39  ;;  %6728 = vrcp.f32 %v3361_v10 }
 0x3e9   :  { %v6721_v47 = vpop.eup %6720  ;;  %6573 = vmatpush3.msra.mxu0 %v1871_v49  ;;  %6574 = vmatprep.mubr.msk.f32.mxu0 %vm6793_vm1, %v6792_v27  ;;  %v1631_v49 = vrot.slane %v1617_v8, %v7020_v39 }
 0x3ea   :  { %v3391_v46 = vmul.f32 %v6721_v47, %v7646_v24  ;;  %6582 = vmatprep.subr.mxu0 %v6792_v27 }
 0x3eb   :  { %v1371_v22 = vpop.permute.xlu0 %1370 }
 0x3ec   :  { %v1600_v9 = vcombine.low %v7678_v60, %v1371_v22  ;;  %v1601_v36 = vcombine.high %v7678_v60, %v1371_v22  ;;  %6570 = vmatmul.mubr.msk.f32.vlgmr.msra.gmra.mxu1 %vm1940_vm2, %v3391_v46  ;;  %6575 = vmatmul.mubr.msk.f32.vlgmr.msra.gmra.mxu0 %vm1940_vm2, %v3392_v52 }
 0x3ed   :  { %6579 = vmatprep.mubr.msk.f32.mxu1 %vm6793_vm1, %v6792_v27  ;;  %6584 = vmatprep.mubr.msk.f32.mxu0 %vm6793_vm1, %v6792_v27  ;;  %v6723_v0 = vpop.eup %6722 }
 0x3ee   :  { %v1608_v24 = vrot.slane %v1600_v9, %v7020_v39  ;;  %v1615_v20 = vrot.slane %v1601_v36, %v7020_v39  ;;  %v3393_v25 = vmul.f32 %v6723_v0, %v7654_v21 }
 0x3f0   :  { %v1632_v26 = vcombine.low %v1608_v24, %v1624_v58  ;;  %v1633_v3 = vcombine.high %v1608_v24, %v1624_v58  ;;  %v1648_v16 = vcombine.low %v1615_v20, %v1631_v49  ;;  %v1649_v41 = vcombine.high %v1615_v20, %v1631_v49 }
 0x3f1   :  { %v6725_v35 = vpop.eup %6724 }
 0x3f2   :  { %v1640_v19 = vrot.slane %v1632_v26, %v7045_v57  ;;  %v1647_v60 = vrot.slane %v1633_v3, %v7045_v57  ;;  %v1656_v6 = vrot.slane %v1648_v16, %v7045_v57  ;;  %v1663_v54 = vrot.slane %v1649_v41, %v7045_v57  ;;  %v6727_v45 = vpop.eup %6726 }
 0x3f3   :  { %v3394_v14 = vmul.f32 %v6725_v35, %v7658_v18  ;;  %v3396_v21 = vmul.f32 %v6727_v45, %v7662_v44 }
 0x3f4   :  { %v1872_v62 = vcombine.low %v1640_v19, %v1647_v60  ;;  %v6242_v30 = vcombine.high %v1640_v19, %v1647_v60  ;;  %v1888_v31 = vcombine.low %v1656_v6, %v1663_v54  ;;  %v6243_v2 = vcombine.high %v1656_v6, %v1663_v54 }
 0x3f5   :  { %v6729_v15 = vpop.eup %6728 }
 0x3f6   :  { %v1879_v5 = vrot.slane %v1872_v62, %v7020_v39  ;;  %v1887_v28 = vrot.slane %v6242_v30, %v7020_v39  ;;  %v1895_v32 = vrot.slane %v1888_v31, %v7020_v39  ;;  %v1903_v29 = vrot.slane %v6243_v2, %v7020_v39 }
 0x3f7   :  { %v3395_v63 = vmul.f32 %v6729_v15, %v7668_v61 }
 0x3f8   :  { %v1904_v53 = vcombine.low %v1879_v5, %v1887_v28  ;;  %v1920_v1 = vcombine.low %v1895_v32, %v1903_v29  ;;  %v1905_v37 = vcombine.high %v1879_v5, %v1887_v28  ;;  %v1921_v23 = vcombine.high %v1895_v32, %v1903_v29 }
 0x3fa   :  { %v1912_v43 = vrot.slane %v1904_v53, %v7045_v57  ;;  %v1928_v7 = vrot.slane %v1920_v1, %v7045_v57  ;;  %v1919_v38 = vrot.slane %v1905_v37, %v7045_v57  ;;  %v1935_v40 = vrot.slane %v1921_v23, %v7045_v57 }
 0x3fc   :  { %v1936_v33 = vcombine.low %v1912_v43, %v1928_v7  ;;  %v1937_v12 = vcombine.high %v1912_v43, %v1928_v7  ;;  %v1938_v51 = vcombine.low %v1919_v38, %v1935_v40  ;;  %v1939_v4 = vcombine.high %v1919_v38, %v1935_v40 }
 0x3fe   :  { %6578 = vmatpush3.msra.mxu1 %v1936_v33  ;;  %6583 = vmatpush3.msra.mxu0 %v1937_v12 }
 0x3ff   :  { %6580 = vmatmul.mubr.msk.f32.vlgmr.msra.gmra.mxu1 %vm1940_vm2, %v3393_v25  ;;  %6585 = vmatmul.mubr.msk.f32.vlgmr.msra.gmra.mxu0 %vm1940_vm2, %v3394_v14 }
 0x400   :  { %6587 = vmatprep.subr.mxu1 %v6792_v27  ;;  %6592 = vmatprep.subr.mxu0 %v6792_v27 }
 0x401   :  { %6588 = vmatpush3.msra.mxu1 %v1938_v51  ;;  %6593 = vmatpush3.msra.mxu0 %v1939_v4 }
 0x402   :  { %6589 = vmatprep.mubr.msk.f32.mxu1 %vm6793_vm1, %v6792_v27  ;;  %6594 = vmatprep.mubr.msk.f32.mxu0 %vm6793_vm1, %v6792_v27 }
 0x403   :  { %6590 = vmatmul.mubr.msk.f32.vlgmr.msra.gmra.mxu1 %vm1940_vm2, %v3395_v63  ;;  %6595 = vmatmul.mubr.msk.f32.vlgmr.msra.gmra.mxu0 %vm1940_vm2, %v3396_v21 }
 0x48b   :  { %v3466_v18 = vpop.f32.mrf.mxu1 }
 0x48c   :  { %v3539_v17 = vpop.f32.mrf.mxu0 }
 0x48d   :  { %v6521_v50 = vpop.f32.mrf.mxu1 }
 0x48e   :  { %v6526_v42 = vpop.f32.mrf.mxu0 }
 0x490   :  { %v3612_v13 = vpop.f32.mrf.mxu1 }
 0x491   :  { %v4565_v56 = vcombine.low %v3466_v18, %v3612_v13  ;;  %v4566_v61 = vcombine.high %v3466_v18, %v3612_v13  ;;  %v5174_v13 = vld [vmem:[%s8258_s5 + $0x18] sm:$0xff] }
 0x492   :  { %v6531_v55 = vpop.f32.mrf.mxu1  ;;  %6597 = vmatprep.subr.mxu1 %v5174_v13 }
 0x493   :  { %v4573_v47 = vrot.slane %v4565_v56, %v7020_v39  ;;  %v4580_v11 = vrot.slane %v4566_v61, %v7020_v39  ;;  %6598 = vmatpush3.msra.mxu1 %v5174_v13 }
 0x494   :  { %v3685_v48 = vpop.f32.mrf.mxu0 }
 0x495   :  { %v4581_v44 = vcombine.low %v3539_v17, %v3685_v48  ;;  %v4582_v59 = vcombine.high %v3539_v17, %v3685_v48 }
 0x496   :  { %v6536_v10 = vpop.f32.mrf.mxu0 }
 0x497   :  { %v4589_v8 = vrot.slane %v4581_v44, %v7020_v39  ;;  %v4596_v46 = vrot.slane %v4582_v59, %v7020_v39 }
 0x499   :  { %v4597_v52 = vcombine.low %v4573_v47, %v4589_v8  ;;  %v4598_v22 = vcombine.high %v4573_v47, %v4589_v8  ;;  %v4613_v9 = vcombine.low %v4580_v11, %v4596_v46  ;;  %v4614_v36 = vcombine.high %v4580_v11, %v4596_v46 }
 0x49b   :  { %v4605_v58 = vrot.slane %v4597_v52, %v7045_v57  ;;  %v4612_v49 = vrot.slane %v4598_v22, %v7045_v57  ;;  %v4621_v24 = vrot.slane %v4613_v9, %v7045_v57  ;;  %v4628_v20 = vrot.slane %v4614_v36, %v7045_v57  ;;  %v3758_v26 = vpop.f32.mrf.mxu1  ;;  %v5173_v22 = vld [vmem:[%s8258_s5 + $0x10] sm:$0xff]  ;;  %v5172_v9 = vld [vmem:[%s8258_s5 + $0x8] sm:$0xff] }
 0x49c   :  { %v3831_v3 = vpop.f32.mrf.mxu0  ;;  %6599 = vmatprep.subr.mxu1 %v5173_v22 }
 0x49d   :  { %v4837_v16 = vcombine.low %v4605_v58, %v4612_v49  ;;  %v6296_v41 = vcombine.high %v4605_v58, %v4612_v49  ;;  %v4853_v19 = vcombine.low %v4621_v24, %v4628_v20  ;;  %v6297_v60 = vcombine.high %v4621_v24, %v4628_v20  ;;  %v6541_v6 = vpop.f32.mrf.mxu1  ;;  %6600 = vmatpush3.msra.mxu1 %v5173_v22 }
 0x49e   :  { %v6546_v54 = vpop.f32.mrf.mxu0  ;;  %6601 = vmatprep.subr.mxu1 %v5172_v9 }
 0x49f   :  { %v4844_v62 = vrot.slane %v4837_v16, %v7020_v39  ;;  %v4852_v30 = vrot.slane %v6296_v41, %v7020_v39  ;;  %v4860_v31 = vrot.slane %v4853_v19, %v7020_v39  ;;  %v4868_v2 = vrot.slane %v6297_v60, %v7020_v39  ;;  %6602 = vmatpush3.msra.mxu1 %v5172_v9 }
 0x4a0   :  { %v3977_v5 = vpop.f32.mrf.mxu0 }
 0x4a1   :  { %v3904_v28 = vpop.f32.mrf.mxu1  ;;  %v4649_v32 = vcombine.low %v3831_v3, %v3977_v5  ;;  %v4650_v29 = vcombine.high %v3831_v3, %v3977_v5  ;;  %v4869_v53 = vcombine.low %v4844_v62, %v4852_v30  ;;  %v4885_v1 = vcombine.low %v4860_v31, %v4868_v2 }
 0x4a2   :  { %v4633_v37 = vcombine.low %v3758_v26, %v3904_v28  ;;  %v4634_v23 = vcombine.high %v3758_v26, %v3904_v28  ;;  %v6556_v0 = vpop.f32.mrf.mxu0  ;;  %v4870_v35 = vcombine.high %v4844_v62, %v4852_v30  ;;  %v4886_v43 = vcombine.high %v4860_v31, %v4868_v2 }
 0x4a3   :  { %v4657_v7 = vrot.slane %v4649_v32, %v7020_v39  ;;  %v4664_v38 = vrot.slane %v4650_v29, %v7020_v39  ;;  %v6551_v40 = vpop.f32.mrf.mxu1  ;;  %v7817_v45 = vrot.slane %v4869_v53, %v7045_v57  ;;  %v7820_v33 = vrot.slane %v4885_v1, %v7045_v57  ;;  %v5171_v29 = vld [vmem:[%s8258_s5] sm:$0xff] }
 0x4a4   :  { %v4641_v12 = vrot.slane %v4633_v37, %v7020_v39  ;;  %v4648_v25 = vrot.slane %v4634_v23, %v7020_v39  ;;  %v4884_v51 = vrot.slane %v4870_v35, %v7045_v57  ;;  %v4900_v4 = vrot.slane %v4886_v43, %v7045_v57  ;;  %6603 = vmatprep.subr.mxu1 %v5171_v29 }
 0x4a5   :  { %v4050_v14 = vpop.f32.mrf.mxu1  ;;  %v4902_v15 = vcombine.high %v7817_v45, %v7820_v33  ;;  %v4901_v63 = vcombine.low %v7817_v45, %v7820_v33  ;;  %6604 = vmatpush3.msra.mxu1 %v5171_v29 }
 0x4a6   :  { %v4665_v21 = vcombine.low %v4641_v12, %v4657_v7  ;;  %v4666_v18 = vcombine.high %v4641_v12, %v4657_v7  ;;  %v4681_v17 = vcombine.low %v4648_v25, %v4664_v38  ;;  %v4682_v50 = vcombine.high %v4648_v25, %v4664_v38 }
 0x4a7   :  { %v6561_v42 = vpop.f32.mrf.mxu1  ;;  %5113 = vrot.lane.b32.xlu0 %v4902_v15, %s6797_s1  ;;  %v4903_v59 = vcombine.low %v4884_v51, %v4900_v4  ;;  %v4904_v52 = vcombine.high %v4884_v51, %v4900_v4 }
 0x4a8   :  { %v4673_v55 = vrot.slane %v4665_v21, %v7045_v57  ;;  %v4680_v56 = vrot.slane %v4666_v18, %v7045_v57  ;;  %v4689_v61 = vrot.slane %v4681_v17, %v7045_v57  ;;  %v4696_v48 = vrot.slane %v4682_v50, %v7045_v57  ;;  %v4123_v44 = vpop.f32.mrf.mxu0 }
 0x4aa   :  { %v4905_v10 = vcombine.low %v4673_v55, %v4680_v56  ;;  %v6298_v47 = vcombine.high %v4673_v55, %v4680_v56  ;;  %v4921_v11 = vcombine.low %v4689_v61, %v4696_v48  ;;  %v6299_v8 = vcombine.high %v4689_v61, %v4696_v48  ;;  %v6566_v46 = vpop.f32.mrf.mxu0 }
 0x4ab   :  { %5129 = vrot.lane.b32.xlu0 %v4903_v59, %s6798_s3 }
 0x4ac   :  { %v4196_v36 = vpop.f32.mrf.mxu1  ;;  %v4269_v58 = vpop.f32.mrf.mxu0  ;;  %v4912_v49 = vrot.slane %v4905_v10, %v7020_v39  ;;  %v4920_v24 = vrot.slane %v6298_v47, %v7020_v39  ;;  %v4928_v20 = vrot.slane %v4921_v11, %v7020_v39  ;;  %v4936_v26 = vrot.slane %v6299_v8, %v7020_v39 }
 0x4ad   :  { %v4701_v3 = vcombine.low %v4050_v14, %v4196_v36  ;;  %v4702_v16 = vcombine.high %v4050_v14, %v4196_v36  ;;  %v4717_v41 = vcombine.low %v4123_v44, %v4269_v58  ;;  %v4718_v19 = vcombine.high %v4123_v44, %v4269_v58 }
 0x4ae   :  { %v6571_v60 = vpop.f32.mrf.mxu1  ;;  %v6576_v6 = vpop.f32.mrf.mxu0  ;;  %v4937_v54 = vcombine.low %v4912_v49, %v4920_v24  ;;  %v4953_v62 = vcombine.low %v4928_v20, %v4936_v26  ;;  %v4938_v30 = vcombine.high %v4912_v49, %v4920_v24  ;;  %v4954_v31 = vcombine.high %v4928_v20, %v4936_v26 }
 0x4af   :  { %v4709_v2 = vrot.slane %v4701_v3, %v7020_v39  ;;  %v4716_v5 = vrot.slane %v4702_v16, %v7020_v39  ;;  %v4725_v28 = vrot.slane %v4717_v41, %v7020_v39  ;;  %v4732_v32 = vrot.slane %v4718_v19, %v7020_v39  ;;  %5145 = vrot.lane.b32.xlu0 %v4904_v52, %s6799_s24 }
 0x4b0   :  { %v7858_v53 = vrot.slane %v4937_v54, %v7045_v57  ;;  %v7861_v1 = vrot.slane %v4953_v62, %v7045_v57  ;;  %v4952_v7 = vrot.slane %v4938_v30, %v7045_v57  ;;  %v4968_v38 = vrot.slane %v4954_v31, %v7045_v57 }
 0x4b1   :  { %v4733_v37 = vcombine.low %v4709_v2, %v4725_v28  ;;  %v4734_v23 = vcombine.high %v4709_v2, %v4725_v28  ;;  %v4749_v0 = vcombine.low %v4716_v5, %v4732_v32  ;;  %v4750_v35 = vcombine.high %v4716_v5, %v4732_v32 }
 0x4b2   :  { %v4970_v43 = vcombine.high %v7858_v53, %v7861_v1  ;;  %v4969_v40 = vcombine.low %v7858_v53, %v7861_v1  ;;  %v4971_v17 = vcombine.low %v4952_v7, %v4968_v38  ;;  %v4972_v59 = vcombine.high %v4952_v7, %v4968_v38 }
 0x4b3   :  { %v4741_v12 = vrot.slane %v4733_v37, %v7045_v57  ;;  %v4748_v25 = vrot.slane %v4734_v23, %v7045_v57  ;;  %v4757_v14 = vrot.slane %v4749_v0, %v7045_v57  ;;  %v4764_v15 = vrot.slane %v4750_v35, %v7045_v57 }
 0x4b4   :  { %5115 = vrot.lane.b32.xlu1 %v4970_v43, %s6797_s1 }
 0x4b5   :  { %v4973_v51 = vcombine.low %v4741_v12, %v4748_v25  ;;  %v6300_v4 = vcombine.high %v4741_v12, %v4748_v25  ;;  %v4989_v21 = vcombine.low %v4757_v14, %v4764_v15  ;;  %v6301_v18 = vcombine.high %v4757_v14, %v4764_v15 }
 0x4b7   :  { %v4980_v50 = vrot.slane %v4973_v51, %v7020_v39  ;;  %v4988_v42 = vrot.slane %v6300_v4, %v7020_v39  ;;  %v4996_v13 = vrot.slane %v4989_v21, %v7020_v39  ;;  %v5004_v55 = vrot.slane %v6301_v18, %v7020_v39 }
 0x4b8   :  { %5131 = vrot.lane.b32.xlu1 %v4971_v17, %s6798_s3 }
 0x4b9   :  { %v5005_v56 = vcombine.low %v4980_v50, %v4988_v42  ;;  %v5021_v61 = vcombine.low %v4996_v13, %v5004_v55  ;;  %v5006_v48 = vcombine.high %v4980_v50, %v4988_v42  ;;  %v5022_v44 = vcombine.high %v4996_v13, %v5004_v55  ;;  %v59_v42 = vld [vmem:[%s8255_s2] sm:$0xff] }
 0x4bb   :  { %v7880_v10 = vrot.slane %v5005_v56, %v7045_v57  ;;  %v7883_v47 = vrot.slane %v5021_v61, %v7045_v57  ;;  %v5020_v8 = vrot.slane %v5006_v48, %v7045_v57  ;;  %v5036_v46 = vrot.slane %v5022_v44, %v7045_v57  ;;  %v62_v44 = vld [vmem:[%s8255_s2 + $0x18] sm:$0xff] }
 0x4bc   :  { %5147 = vrot.lane.b32.xlu1 %v4972_v59, %s6799_s24  ;;  %v6800_v48 = vmov 0  }
 0x4bd   :  { %v5038_v11 = vcombine.high %v7880_v10, %v7883_v47  ;;  %v5037_v52 = vcombine.low %v7880_v10, %v7883_v47  ;;  %v5039_v49 = vcombine.low %v5020_v8, %v5036_v46  ;;  %v5040_v6 = vcombine.high %v5020_v8, %v5036_v46  ;;  %6665 = vset.pattern.permute.xlu1 %v6800_v48  ;;  %v60_v8 = vld [vmem:[%s8255_s2 + $0x8] sm:$0xff]  ;;  %v61_v46 = vld [vmem:[%s8255_s2 + $0x10] sm:$0xff]  ;;  %v5446_v10 = vld [vmem:[%s8262_s9 + $0x18] sm:$0xff] }
 0x4be   :  { %6664 = vset.pattern.permute.xlu0 %v6800_v48  ;;  %6611 = vmatprep.subr.mxu0 %v5446_v10  ;;  %v5445_v47 = vld [vmem:[%s8262_s9 + $0x10] sm:$0xff] }
 0x4bf   :  { %5117 = vrot.lane.b32.xlu0 %v5038_v11, %s6797_s1  ;;  %v4342_v22 = vpop.f32.mrf.mxu1  ;;  %v4415_v9 = vpop.f32.mrf.mxu0  ;;  %6612 = vmatpush3.msra.mxu0 %v5446_v10 }
 0x4c0   :  { %6613 = vmatprep.subr.mxu0 %v5445_v47 }
 0x4c1   :  { %v6581_v36 = vpop.f32.mrf.mxu1  ;;  %v6586_v58 = vpop.f32.mrf.mxu0  ;;  %6614 = vmatpush3.msra.mxu0 %v5445_v47 }
 0x4c3   :  { %5133 = vrot.lane.b32.xlu0 %v5039_v49, %s6798_s3  ;;  %v4488_v24 = vpop.f32.mrf.mxu1  ;;  %v4561_v20 = vpop.f32.mrf.mxu0 }
 0x4c4   :  { %v4769_v26 = vcombine.low %v4342_v22, %v4488_v24  ;;  %v4770_v3 = vcombine.high %v4342_v22, %v4488_v24  ;;  %v4785_v16 = vcombine.low %v4415_v9, %v4561_v20  ;;  %v4786_v41 = vcombine.high %v4415_v9, %v4561_v20 }
 0x4c5   :  { %v6591_v19 = vpop.f32.mrf.mxu1  ;;  %v6596_v60 = vpop.f32.mrf.mxu0 }
 0x4c6   :  { %v4777_v54 = vrot.slane %v4769_v26, %v7020_v39  ;;  %v4784_v62 = vrot.slane %v4770_v3, %v7020_v39  ;;  %v4793_v30 = vrot.slane %v4785_v16, %v7020_v39  ;;  %v4800_v31 = vrot.slane %v4786_v41, %v7020_v39 }
 0x4c7   :  { %5149 = vrot.lane.b32.xlu0 %v5040_v6, %s6799_s24 }
 0x4c8   :  { %v4801_v2 = vcombine.low %v4777_v54, %v4793_v30  ;;  %v4802_v5 = vcombine.high %v4777_v54, %v4793_v30  ;;  %v4817_v28 = vcombine.low %v4784_v62, %v4800_v31  ;;  %v4818_v32 = vcombine.high %v4784_v62, %v4800_v31 }
 0x4ca   :  { %v4809_v29 = vrot.slane %v4801_v2, %v7045_v57  ;;  %v4816_v37 = vrot.slane %v4802_v5, %v7045_v57  ;;  %v4825_v23 = vrot.slane %v4817_v28, %v7045_v57  ;;  %v4832_v0 = vrot.slane %v4818_v32, %v7045_v57  ;;  %v5443_v2 = vld [vmem:[%s8262_s9] sm:$0xff]  ;;  %v5562_v5 = vld [vmem:[%s8264_s11 + $0x38] sm:$0xff]  ;;  %v5561_v28 = vld [vmem:[%s8264_s11 + $0x30] sm:$0xff] }
 0x4cb   :  { %5274 = vperm.xlu0 %6664, %v59_v42   ;;  %6625 = vmatprep.subr.mxu1 %v5562_v5  ;;  %v5560_v32 = vld [vmem:[%s8264_s11 + $0x28] sm:$0xff] }
 0x4cc   :  { %v5041_v35 = vcombine.low %v4809_v29, %v4816_v37  ;;  %v6302_v43 = vcombine.high %v4809_v29, %v4816_v37  ;;  %v5057_v7 = vcombine.low %v4825_v23, %v4832_v0  ;;  %v6303_v38 = vcombine.high %v4825_v23, %v4832_v0  ;;  %v5559_v29 = vld [vmem:[%s8264_s11 + $0x20] sm:$0xff] }
 0x4cd   :  { %v6308_v0 = vld [vmem:[%s8259_s6] ss:$0 sm:$0xff] }
 0x4ce   :  { %v5048_v12 = vrot.slane %v5041_v35, %v7020_v39  ;;  %v5056_v25 = vrot.slane %v6302_v43, %v7020_v39  ;;  %v5064_v14 = vrot.slane %v5057_v7, %v7020_v39  ;;  %v5072_v15 = vrot.slane %v6303_v38, %v7020_v39 }
 0x4cf   :  { %5289 = vperm.xlu0 %6664, %v62_v44  }
 0x4d0   :  { %v5073_v51 = vcombine.low %v5048_v12, %v5056_v25  ;;  %v5089_v4 = vcombine.low %v5064_v14, %v5072_v15  ;;  %v5074_v21 = vcombine.high %v5048_v12, %v5056_v25  ;;  %v5090_v18 = vcombine.high %v5064_v14, %v5072_v15  ;;  %v6762_v25 = vld [vmem:[%s8253_s0 + $0x8] sm:$0xff] }
 0x4d2   :  { %v5081_v17 = vrot.slane %v5073_v51, %v7045_v57  ;;  %v5097_v50 = vrot.slane %v5089_v4, %v7045_v57  ;;  %v5088_v55 = vrot.slane %v5074_v21, %v7045_v57  ;;  %v5104_v56 = vrot.slane %v5090_v18, %v7045_v57  ;;  %v6763_v4 = vld [vmem:[%s8253_s0] sm:$0xff] }
 0x4d4   :  { %v5106_v13 = vcombine.high %v5081_v17, %v5097_v50  ;;  %v5105_v61 = vcombine.low %v5081_v17, %v5097_v50  ;;  %v5107_v59 = vcombine.low %v5088_v55, %v5104_v56  ;;  %v5108_v11 = vcombine.high %v5088_v55, %v5104_v56 }
 0x4d6   :  { %5119 = vrot.lane.b32.xlu1 %v5106_v13, %s6797_s1 }
 0x4da   :  { %5135 = vrot.lane.b32.xlu1 %v5107_v59, %s6798_s3 }
 0x4de   :  { %5151 = vrot.lane.b32.xlu1 %v5108_v11, %s6799_s24 }
 0x4e2   :  { %5279 = vperm.xlu1 %6665, %v60_v8  }
 0x4e6   :  { %5284 = vperm.xlu1 %6665, %v61_v46  }
 0x519   :  { %v5114_v22 = vpop.permute.xlu0 %5113 }
 0x51a   :  { %v5157_v36 = vsel %vm1940_vm2, %v4901_v63, %v5114_v22 }
 0x51d   :  { %v5130_v9 = vpop.permute.xlu0 %5129 }
 0x51e   :  { %v5162_v58 = vsel %vm5161_vm3, %v5157_v36, %v5130_v9 }
 0x521   :  { %v5146_v49 = vpop.permute.xlu0 %5145 }
 0x522   :  { %v5167_v24 = vsel %vm5166_vm4, %v5162_v58, %v5146_v49 }
 0x523   :  { %6605 = vmatprep.mubr.msk.f32.mxu1 %vm74_vm0, %v5167_v24 }
 0x526   :  { %v5116_v20 = vpop.permute.xlu1 %5115 }
 0x527   :  { %v5158_v3 = vsel %vm1940_vm2, %v4969_v40, %v5116_v20 }
 0x52a   :  { %v5132_v26 = vpop.permute.xlu1 %5131 }
 0x52b   :  { %v5163_v16 = vsel %vm5161_vm3, %v5158_v3, %v5132_v26 }
 0x52e   :  { %v5148_v41 = vpop.permute.xlu1 %5147 }
 0x52f   :  { %v5168_v45 = vsel %vm5166_vm4, %v5163_v16, %v5148_v41 }
 0x530   :  { %6606 = vmatmul.mubr.msk.f32.vlgmr.msra.gmra.mxu1 %vm74_vm0, %v5168_v45 }
 0x531   :  { %v5118_v33 = vpop.permute.xlu0 %5117  ;;  %6626 = vmatpush3.msra.mxu1 %v5562_v5 }
 0x532   :  { %v5159_v19 = vsel %vm1940_vm2, %v5037_v52, %v5118_v33  ;;  %v5444_v52 = vld [vmem:[%s8262_s9 + $0x8] sm:$0xff]  ;;  %6627 = vmatprep.subr.mxu1 %v5561_v28 }
 0x533   :  { %6615 = vmatprep.subr.mxu0 %v5444_v52  ;;  %6628 = vmatpush3.msra.mxu1 %v5561_v28 }
 0x534   :  { %6616 = vmatpush3.msra.mxu0 %v5444_v52  ;;  %6629 = vmatprep.subr.mxu1 %v5560_v32 }
 0x535   :  { %v5134_v63 = vpop.permute.xlu0 %5133  ;;  %6617 = vmatprep.subr.mxu0 %v5443_v2  ;;  %6630 = vmatpush3.msra.mxu1 %v5560_v32 }
 0x536   :  { %v5164_v60 = vsel %vm5161_vm3, %v5159_v19, %v5134_v63  ;;  %6618 = vmatpush3.msra.mxu0 %v5443_v2  ;;  %6631 = vmatprep.subr.mxu1 %v5559_v29  ;;  %v6764_v2 = vld [vmem:[%s8253_s0 + $0x18] sm:$0xff] }
 0x537   :  { %6632 = vmatpush3.msra.mxu1 %v5559_v29 }
 0x539   :  { %v5150_v6 = vpop.permute.xlu0 %5149 }
 0x53a   :  { %v5169_v53 = vsel %vm5166_vm4, %v5164_v60, %v5150_v6 }
 0x53b   :  { %6608 = vmatprep.mubr.msk.f32.mxu1 %vm74_vm0, %v5169_v53 }
 0x546   :  { %v5275_v35 = vpop.permute.xlu0 %5274 }
 0x548   :  { %v5120_v1 = vpop.permute.xlu1 %5119 }
 0x549   :  { %v5160_v54 = vsel %vm1940_vm2, %v5105_v61, %v5120_v1 }
 0x54a   :  { %v5290_v19 = vpop.permute.xlu0 %5289 }
 0x54c   :  { %v5136_v40 = vpop.permute.xlu1 %5135 }
 0x54d   :  { %v5165_v62 = vsel %vm5161_vm3, %v5160_v54, %v5136_v40 }
 0x550   :  { %v5152_v30 = vpop.permute.xlu1 %5151 }
 0x551   :  { %v5170_v31 = vsel %vm5166_vm4, %v5165_v62, %v5152_v30 }
 0x552   :  { %6609 = vmatmul.mubr.msk.f32.gmra.mxu1 %vm74_vm0, %v5170_v31 }
 0x55d   :  { %v5280_v37 = vpop.permute.xlu1 %5279 }
 0x561   :  { %v5285_v40 = vpop.permute.xlu1 %5284 }
 0x5f0   :  { %v6607_v23 = vpop.f32.mrf.mxu1 }
 0x5f1   :  { %v5293_v43 = vmul.f32 %v6607_v23, %v5280_v37  ;;  %v6765_v37 = vld [vmem:[%s8253_s0 + $0x10] sm:$0xff] }
 0x5f2   :  { %v5253_v7 = vpop.f32.mrf.mxu1 }
 0x5f3   :  { %v5304_v38 = vadd.f32 %v6308_v0, %v5293_v43  ;;  %v5292_v12 = vmul.f32 %v5275_v35, %v5253_v7 }
 0x5f5   :  { %v5308_v14 = vadd.f32 %v6762_v25, %v5304_v38  ;;  %v5303_v15 = vadd.f32 %v6308_v0, %v5292_v12 }
 0x5f7   :  { %v5318_v51 = vsel %vm74_vm0, %v5308_v14, 0.0  ;;  %v5307_v21 = vadd.f32 %v6763_v4, %v5303_v15 }
 0x5f8   :  { %v5319_v18 = vrot.slane %v5318_v51, 4 }
 0x5f9   :  { %v5311_v17 = vsel %vm74_vm0, %v5307_v21, 0.0 }
 0x5fa   :  { %v5320_v50 = vadd.f32 %v5319_v18, %v5318_v51  ;;  %v5312_v42 = vrot.slane %v5311_v17, 4 }
 0x5fc   :  { %v5321_v13 = vrot.slane %v5320_v50, 2  ;;  %v5313_v55 = vadd.f32 %v5312_v42, %v5311_v17 }
 0x5fe   :  { %v5322_v56 = vadd.f32 %v5321_v13, %v5320_v50  ;;  %v5314_v61 = vrot.slane %v5313_v55, 2 }
 0x600   :  { %v5323_v48 = vrot.slane %v5322_v56, 1  ;;  %v5315_v44 = vadd.f32 %v5314_v61, %v5313_v55 }
 0x602   :  { %v5324_v59 = vadd.f32 %v5323_v48, %v5322_v56  ;;  %v5316_v11 = vrot.slane %v5315_v44, 1 }
 0x604   :  { %v5341_v8 = vmul.f32 0.125, %v5324_v59  ;;  %v5317_v46 = vadd.f32 %v5316_v11, %v5315_v44 }
 0x606   :  { %v7986_v22 = vsub.f32 %v5308_v14, %v5341_v8  ;;  %v5340_v9 = vmul.f32 0.125, %v5317_v46 }
 0x608   :  { %v5349_v36 = vmul.f32 %v7986_v22, %v7986_v22  ;;  %v7990_v58 = vsub.f32 %v5307_v21, %v5340_v9 }
 0x60a   :  { %v5359_v49 = vsel %vm74_vm0, %v5349_v36, 0.0  ;;  %v5348_v24 = vmul.f32 %v7990_v58, %v7990_v58 }
 0x60b   :  { %v5360_v20 = vrot.slane %v5359_v49, 4 }
 0x60c   :  { %v5352_v26 = vsel %vm74_vm0, %v5348_v24, 0.0 }
 0x60d   :  { %v5361_v3 = vadd.f32 %v5360_v20, %v5359_v49  ;;  %v5353_v16 = vrot.slane %v5352_v26, 4 }
 0x60f   :  { %v5362_v41 = vrot.slane %v5361_v3, 2  ;;  %v5354_v45 = vadd.f32 %v5353_v16, %v5352_v26 }
 0x611   :  { %v5363_v33 = vadd.f32 %v5362_v41, %v5361_v3  ;;  %v5355_v63 = vrot.slane %v5354_v45, 2 }
 0x612   :  { %v6610_v60 = vpop.f32.mrf.mxu1 }
 0x613   :  { %v5364_v6 = vrot.slane %v5363_v33, 1  ;;  %v5356_v53 = vadd.f32 %v5355_v63, %v5354_v45  ;;  %v5295_v1 = vmul.f32 %v6610_v60, %v5290_v19 }
 0x614   :  { %v5263_v54 = vpop.f32.mrf.mxu1 }
 0x615   :  { %v5365_v62 = vadd.f32 %v5364_v6, %v5363_v33  ;;  %v5357_v30 = vrot.slane %v5356_v53, 1  ;;  %v5306_v31 = vadd.f32 %v6308_v0, %v5295_v1  ;;  %v5294_v10 = vmul.f32 %v5285_v40, %v5263_v54  ;;  %v6309_v54 = vld [vmem:[%s8260_s7] ss:$0 sm:$0xff] }
 0x617   :  { %v5382_v47 = vmul.f32 0.14285715, %v5365_v62  ;;  %v5358_v52 = vadd.f32 %v5357_v30, %v5356_v53  ;;  %v5310_v5 = vadd.f32 %v6764_v2, %v5306_v31  ;;  %v5305_v28 = vadd.f32 %v6308_v0, %v5294_v10 }
 0x619   :  { %6730 = vrsqrt.f32 %v5382_v47  ;;  %v5381_v32 = vmul.f32 0.14285715, %v5358_v52  ;;  %v5332_v29 = vsel %vm74_vm0, %v5310_v5, 0.0  ;;  %v5309_v23 = vadd.f32 %v6765_v37, %v5305_v28 }
 0x61a   :  { %v5333_v35 = vrot.slane %v5332_v29, 4  ;;  %vm5394_vm5 = vcmp.eq.f32.partialorder %v5382_v47, inf  ;;  %v5397_v42 = vand.u32 2147483648, %v5382_v47  ;;  %vm5396_vm6 = vcmp.eq.f32.partialorder %v5382_v47, 0.0 }
 0x61b   :  { %6732 = vrsqrt.f32 %v5381_v32  ;;  %v5325_v7 = vsel %vm74_vm0, %v5309_v23, 0.0  ;;  %vm5387_vm7 = vcmp.eq.f32.partialorder %v5381_v32, inf  ;;  %v5390_v11 = vand.u32 2147483648, %v5381_v32 }
 0x61c   :  { %v5334_v43 = vadd.f32 %v5333_v35, %v5332_v29  ;;  %v5326_v38 = vrot.slane %v5325_v7, 4  ;;  %vm5389_vm8 = vcmp.eq.f32.partialorder %v5381_v32, 0.0 }
 0x61e   :  { %v5335_v12 = vrot.slane %v5334_v43, 2  ;;  %v5327_v25 = vadd.f32 %v5326_v38, %v5325_v7 }
 0x620   :  { %v5336_v14 = vadd.f32 %v5335_v12, %v5334_v43  ;;  %v5328_v15 = vrot.slane %v5327_v25, 2 }
 0x622   :  { %v5337_v0 = vrot.slane %v5336_v14, 1  ;;  %v5329_v51 = vadd.f32 %v5328_v15, %v5327_v25 }
 0x624   :  { %v5338_v4 = vadd.f32 %v5337_v0, %v5336_v14  ;;  %v5330_v18 = vrot.slane %v5329_v51, 1 }
 0x626   :  { %v6731_v21 = vpop.eup %6730  ;;  %v5343_v50 = vmul.f32 0.125, %v5338_v4  ;;  %v5331_v13 = vadd.f32 %v5330_v18, %v5329_v51 }
 0x627   :  { %v5393_v17 = vmul.f32 %v6731_v21, %v5382_v47 }
 0x628   :  { %v6733_v55 = vpop.eup %6732  ;;  %v5347_v61 = vsub.f32 %v5310_v5, %v5343_v50  ;;  %v5342_v59 = vmul.f32 0.125, %v5331_v13  ;;  %v6310_v5 = vld [vmem:[%s8261_s8] ss:$0 sm:$0xff]  ;;  %v5557_v50 = vld [vmem:[%s8264_s11 + $0x10] sm:$0xff] }
 0x629   :  { %v5395_v56 = vsel %vm5394_vm5, %v5382_v47, %v5393_v17  ;;  %v5386_v44 = vmul.f32 %v6733_v55, %v5381_v32  ;;  %v5558_v17 = vld [vmem:[%s8264_s11 + $0x18] sm:$0xff]  ;;  %v5555_v13 = vld [vmem:[%s8264_s11] sm:$0xff] }
 0x62a   :  { %v5398_v48 = vsel %vm5396_vm6, %v5397_v42, %v5395_v56  ;;  %v5351_v8 = vmul.f32 %v5347_v61, %v5347_v61  ;;  %v5346_v9 = vsub.f32 %v5309_v23, %v5342_v59  ;;  %6633 = vmatprep.subr.mxu1 %v5558_v17  ;;  %v5556_v42 = vld [vmem:[%s8264_s11 + $0x8] sm:$0xff]  ;;  %v6311_v55 = vld [vmem:[%s8263_s10] ss:$0 sm:$0xff] }
 0x62b   :  { %6734 = vrcp.f32 %v5398_v48  ;;  %v5388_v46 = vsel %vm5387_vm7, %v5381_v32, %v5386_v44  ;;  %6634 = vmatpush3.msra.mxu1 %v5558_v17  ;;  %vm6102_vm7 = vcmask 785408  }
 0x62c   :  { %v5391_v36 = vsel %vm5389_vm8, %v5390_v11, %v5388_v46  ;;  %v5373_v49 = vsel %vm74_vm0, %v5351_v8, 0.0  ;;  %v5350_v20 = vmul.f32 %v5346_v9, %v5346_v9  ;;  %6635 = vmatprep.subr.mxu1 %v5557_v50 }
 0x62d   :  { %6736 = vrcp.f32 %v5391_v36  ;;  %v5374_v24 = vrot.slane %v5373_v49, 4  ;;  %6636 = vmatpush3.msra.mxu1 %v5557_v50 }
 0x62e   :  { %v5366_v3 = vsel %vm74_vm0, %v5350_v20, 0.0  ;;  %6637 = vmatprep.subr.mxu1 %v5556_v42  ;;  %v6316_v20 = vld [vmem:[%s8265_s12] ss:$0 sm:$0xff] }
 0x62f   :  { %v5375_v26 = vadd.f32 %v5374_v24, %v5373_v49  ;;  %v5367_v16 = vrot.slane %v5366_v3, 4  ;;  %6638 = vmatpush3.msra.mxu1 %v5556_v42 }
 0x630   :  { %6639 = vmatprep.subr.mxu1 %v5555_v13 }
 0x631   :  { %v5376_v41 = vrot.slane %v5375_v26, 2  ;;  %v5368_v45 = vadd.f32 %v5367_v16, %v5366_v3  ;;  %6640 = vmatpush3.msra.mxu1 %v5555_v13 }
 0x633   :  { %v5377_v33 = vadd.f32 %v5376_v41, %v5375_v26  ;;  %v5369_v63 = vrot.slane %v5368_v45, 2 }
 0x635   :  { %v5378_v19 = vrot.slane %v5377_v33, 1  ;;  %v5370_v60 = vadd.f32 %v5369_v63, %v5368_v45 }
 0x637   :  { %v5379_v53 = vadd.f32 %v5378_v19, %v5377_v33  ;;  %v5371_v40 = vrot.slane %v5370_v60, 1 }
 0x638   :  { %v6735_v6 = vpop.eup %6734 }
 0x639   :  { %v5416_v1 = vmul.f32 %v6735_v6, %v7986_v22  ;;  %v5384_v62 = vmul.f32 0.14285715, %v5379_v53  ;;  %v5372_v31 = vadd.f32 %v5371_v40, %v5370_v60 }
 0x63a   :  { %v6737_v30 = vpop.eup %6736 }
 0x63b   :  { %v5414_v10 = vmul.f32 %v6737_v30, %v7990_v58  ;;  %6738 = vrsqrt.f32 %v5384_v62  ;;  %v5429_v47 = vmul.f32 %v6309_v54, %v5416_v1  ;;  %v5383_v52 = vmul.f32 0.14285715, %v5372_v31 }
 0x63c   :  { %vm5408_vm9 = vcmp.eq.f32.partialorder %v5384_v62, inf  ;;  %v5411_v29 = vand.u32 2147483648, %v5384_v62  ;;  %vm5410_vm10 = vcmp.eq.f32.partialorder %v5384_v62, 0.0 }
 0x63d   :  { %v5428_v2 = vmul.f32 %v6309_v54, %v5414_v10  ;;  %6740 = vrsqrt.f32 %v5383_v52  ;;  %v8016_v28 = vadd.f32 %v6310_v5, %v5429_v47  ;;  %vm5401_vm11 = vcmp.eq.f32.partialorder %v5383_v52, inf }
 0x63e   :  { %v5404_v7 = vand.u32 2147483648, %v5383_v52  ;;  %vm5403_vm12 = vcmp.eq.f32.partialorder %v5383_v52, 0.0 }
 0x63f   :  { %v8014_v22 = vadd.f32 %v6310_v5, %v5428_v2 }
 0x641   :  { %6619 = vmatprep.mubr.msk.f32.mxu0 %vm74_vm0, %v8014_v22 }
 0x642   :  { %6620 = vmatmul.mubr.msk.f32.vlgmr.msra.gmra.mxu0 %vm74_vm0, %v8016_v28 }
 0x648   :  { %v6739_v58 = vpop.eup %6738 }
 0x649   :  { %v5407_v32 = vmul.f32 %v6739_v58, %v5384_v62 }
 0x64a   :  { %v6741_v37 = vpop.eup %6740 }
 0x64b   :  { %v5409_v23 = vsel %vm5408_vm9, %v5384_v62, %v5407_v32  ;;  %v5400_v43 = vmul.f32 %v6741_v37, %v5383_v52 }
 0x64c   :  { %v5412_v35 = vsel %vm5410_vm10, %v5411_v29, %v5409_v23 }
 0x64d   :  { %6742 = vrcp.f32 %v5412_v35  ;;  %v5402_v38 = vsel %vm5401_vm11, %v5383_v52, %v5400_v43 }
 0x64e   :  { %v5405_v12 = vsel %vm5403_vm12, %v5404_v7, %v5402_v38 }
 0x64f   :  { %6744 = vrcp.f32 %v5405_v12 }
 0x65a   :  { %v6743_v25 = vpop.eup %6742 }
 0x65b   :  { %v5420_v14 = vmul.f32 %v6743_v25, %v5347_v61 }
 0x65c   :  { %v6745_v15 = vpop.eup %6744 }
 0x65d   :  { %v5418_v0 = vmul.f32 %v6745_v15, %v5346_v9  ;;  %v5431_v51 = vmul.f32 %v6309_v54, %v5420_v14 }
 0x65f   :  { %v5430_v4 = vmul.f32 %v6309_v54, %v5418_v0  ;;  %v8024_v18 = vadd.f32 %v6310_v5, %v5431_v51 }
 0x661   :  { %v8022_v21 = vadd.f32 %v6310_v5, %v5430_v4 }
 0x663   :  { %6622 = vmatprep.mubr.msk.f32.mxu0 %vm74_vm0, %v8022_v21 }
 0x664   :  { %6623 = vmatmul.mubr.msk.f32.gmra.mxu0 %vm74_vm0, %v8024_v18 }
 0x702   :  { %v6621_v56 = vpop.f32.mrf.mxu0 }
 0x703   :  { %v5538_v61 = vadd.f32 %v6621_v56, %v6311_v55 }
 0x704   :  { %v5532_v48 = vpop.f32.mrf.mxu0 }
 0x705   :  { %v5533_v44 = vadd.f32 %v6311_v55, %v5532_v48  ;;  %v5552_v11 = vmax.f32 %v5538_v61, 0.0 }
 0x707   :  { %v5551_v59 = vmax.f32 %v5533_v44, 0.0 }
 0x709   :  { %6641 = vmatprep.mubr.msk.f32.mxu1 %vm5570_vm13, %v5551_v59 }
 0x70a   :  { %6642 = vmatmul.mubr.msk.f32.vlgmr.msra.gmra.mxu1 %vm5570_vm13, %v5552_v11 }
 0x724   :  { %v6624_v8 = vpop.f32.mrf.mxu0 }
 0x725   :  { %v5548_v46 = vadd.f32 %v6624_v8, %v6311_v55 }
 0x726   :  { %v5542_v9 = vpop.f32.mrf.mxu0 }
 0x727   :  { %v5543_v36 = vadd.f32 %v6311_v55, %v5542_v9  ;;  %v5554_v24 = vmax.f32 %v5548_v46, 0.0 }
 0x729   :  { %v5553_v49 = vmax.f32 %v5543_v36, 0.0 }
 0x72b   :  { %6644 = vmatprep.mubr.msk.f32.mxu1 %vm5570_vm13, %v5553_v49 }
 0x72c   :  { %6645 = vmatmul.mubr.msk.f32.gmra.mxu1 %vm5570_vm13, %v5554_v24 }
 0x7ca   :  { %v6643_v26 = vpop.f32.mrf.mxu1 }
 0x7cb   :  { %v5655_v3 = vadd.f32 %v6643_v26, %v6316_v20 }
 0x7cc   :  { %v5649_v16 = vpop.f32.mrf.mxu1 }
 0x7cd   :  { %v5669_v41 = vadd.f32 %v5655_v3, %v8016_v28  ;;  %v5650_v45 = vadd.f32 %v6316_v20, %v5649_v16 }
 0x7cf   :  { %v5679_v33 = vsel %vm74_vm0, %v5669_v41, 0.0  ;;  %v5668_v63 = vadd.f32 %v5650_v45, %v8014_v22 }
 0x7d0   :  { %v5680_v19 = vrot.slane %v5679_v33, 4 }
 0x7d1   :  { %v5672_v60 = vsel %vm74_vm0, %v5668_v63, 0.0 }
 0x7d2   :  { %v5681_v6 = vadd.f32 %v5680_v19, %v5679_v33  ;;  %v5673_v53 = vrot.slane %v5672_v60, 4 }
 0x7d4   :  { %v5682_v1 = vrot.slane %v5681_v6, 2  ;;  %v5674_v40 = vadd.f32 %v5673_v53, %v5672_v60 }
 0x7d6   :  { %v5683_v54 = vadd.f32 %v5682_v1, %v5681_v6  ;;  %v5675_v62 = vrot.slane %v5674_v40, 2 }
 0x7d8   :  { %v5684_v30 = vrot.slane %v5683_v54, 1  ;;  %v5676_v31 = vadd.f32 %v5675_v62, %v5674_v40 }
 0x7da   :  { %v5685_v10 = vadd.f32 %v5684_v30, %v5683_v54  ;;  %v5677_v47 = vrot.slane %v5676_v31, 1 }
 0x7dc   :  { %v5701_v52 = vmul.f32 0.125, %v5685_v10  ;;  %v5678_v2 = vadd.f32 %v5677_v47, %v5676_v31 }
 0x7de   :  { %v8056_v5 = vsub.f32 %v5669_v41, %v5701_v52  ;;  %v5700_v28 = vmul.f32 0.125, %v5678_v2 }
 0x7e0   :  { %v5709_v22 = vmul.f32 %v8056_v5, %v8056_v5  ;;  %v8060_v58 = vsub.f32 %v5668_v63, %v5700_v28 }
 0x7e2   :  { %v5719_v32 = vsel %vm74_vm0, %v5709_v22, 0.0  ;;  %v5708_v29 = vmul.f32 %v8060_v58, %v8060_v58 }
 0x7e3   :  { %v5720_v37 = vrot.slane %v5719_v32, 4 }
 0x7e4   :  { %v5712_v23 = vsel %vm74_vm0, %v5708_v29, 0.0 }
 0x7e5   :  { %v5721_v35 = vadd.f32 %v5720_v37, %v5719_v32  ;;  %v5713_v43 = vrot.slane %v5712_v23, 4 }
 0x7e7   :  { %v5722_v7 = vrot.slane %v5721_v35, 2  ;;  %v5714_v38 = vadd.f32 %v5713_v43, %v5712_v23 }
 0x7e9   :  { %v5723_v12 = vadd.f32 %v5722_v7, %v5721_v35  ;;  %v5715_v25 = vrot.slane %v5714_v38, 2 }
 0x7eb   :  { %v5724_v14 = vrot.slane %v5723_v12, 1  ;;  %v5716_v15 = vadd.f32 %v5715_v25, %v5714_v38  ;;  %v8083_v38 = vld [vmem:[%s8266_s13] ss:$0 sm:$0xff]  ;;  %s6801_s13 = smov 32  }
 0x7ec   :  { %v6646_v4 = vpop.f32.mrf.mxu1 }
 0x7ed   :  { %v5725_v0 = vadd.f32 %v5724_v14, %v5723_v12  ;;  %v5717_v51 = vrot.slane %v5716_v15, 1  ;;  %v5665_v17 = vadd.f32 %v6646_v4, %v6316_v20 }
 0x7ee   :  { %v5659_v13 = vpop.f32.mrf.mxu1 }
 0x7ef   :  { %v5741_v50 = vmul.f32 0.14285715, %v5725_v0  ;;  %v5718_v42 = vadd.f32 %v5717_v51, %v5716_v15  ;;  %v5671_v55 = vadd.f32 %v5665_v17, %v8024_v18  ;;  %v5660_v56 = vadd.f32 %v6316_v20, %v5659_v13  ;;  %v8089_v0 = vld [vmem:[%s8267_s14] ss:$0 sm:$0xff]  ;;  %s6803_s14 = smov [#allocation2]  }
 0x7f1   :  { %6746 = vrsqrt.f32 %v5741_v50  ;;  %v5740_v61 = vmul.f32 0.14285715, %v5718_v42  ;;  %v5693_v48 = vsel %vm74_vm0, %v5671_v55, 0.0  ;;  %v5670_v44 = vadd.f32 %v5660_v56, %v8022_v21 }
 0x7f2   :  { %v5694_v59 = vrot.slane %v5693_v48, 4  ;;  %vm5753_vm14 = vcmp.eq.f32.partialorder %v5741_v50, inf  ;;  %v5756_v33 = vand.u32 2147483648, %v5741_v50  ;;  %vm5755_vm15 = vcmp.eq.f32.partialorder %v5741_v50, 0.0 }
 0x7f3   :  { %6748 = vrsqrt.f32 %v5740_v61  ;;  %v5686_v8 = vsel %vm74_vm0, %v5670_v44, 0.0  ;;  %vm5746_vm1 = vcmp.eq.f32.partialorder %v5740_v61, inf  ;;  %v5749_v40 = vand.u32 2147483648, %v5740_v61 }
 0x7f4   :  { %v5695_v11 = vadd.f32 %v5694_v59, %v5693_v48  ;;  %v5687_v46 = vrot.slane %v5686_v8, 4  ;;  %vm5748_vm2 = vcmp.eq.f32.partialorder %v5740_v61, 0.0 }
 0x7f6   :  { %v5696_v9 = vrot.slane %v5695_v11, 2  ;;  %v5688_v36 = vadd.f32 %v5687_v46, %v5686_v8 }
 0x7f8   :  { %v5697_v49 = vadd.f32 %v5696_v9, %v5695_v11  ;;  %v5689_v24 = vrot.slane %v5688_v36, 2 }
 0x7fa   :  { %v5698_v26 = vrot.slane %v5697_v49, 1  ;;  %v5690_v3 = vadd.f32 %v5689_v24, %v5688_v36 }
 0x7fc   :  { %v5699_v18 = vadd.f32 %v5698_v26, %v5697_v49  ;;  %v5691_v16 = vrot.slane %v5690_v3, 1 }
 0x7fe   :  { %v6747_v20 = vpop.eup %6746  ;;  %v5703_v45 = vmul.f32 0.125, %v5699_v18  ;;  %v5692_v21 = vadd.f32 %v5691_v16, %v5690_v3 }
 0x7ff   :  { %v5752_v41 = vmul.f32 %v6747_v20, %v5741_v50 }
 0x800   :  { %v6749_v63 = vpop.eup %6748  ;;  %v8070_v60 = vsub.f32 %v5671_v55, %v5703_v45  ;;  %v5702_v1 = vmul.f32 0.125, %v5692_v21 }
 0x801   :  { %v5754_v19 = vsel %vm5753_vm14, %v5741_v50, %v5752_v41  ;;  %v5745_v53 = vmul.f32 %v6749_v63, %v5740_v61 }
 0x802   :  { %v5757_v6 = vsel %vm5755_vm15, %v5756_v33, %v5754_v19  ;;  %v5711_v54 = vmul.f32 %v8070_v60, %v8070_v60  ;;  %v8074_v30 = vsub.f32 %v5670_v44, %v5702_v1 }
 0x803   :  { %6750 = vrcp.f32 %v5757_v6  ;;  %v5747_v62 = vsel %vm5746_vm1, %v5740_v61, %v5745_v53 }
 0x804   :  { %v5750_v31 = vsel %vm5748_vm2, %v5749_v40, %v5747_v62  ;;  %v5733_v10 = vsel %vm74_vm0, %v5711_v54, 0.0  ;;  %v5710_v52 = vmul.f32 %v8074_v30, %v8074_v30 }
 0x805   :  { %6752 = vrcp.f32 %v5750_v31  ;;  %v5734_v47 = vrot.slane %v5733_v10, 4 }
 0x806   :  { %v5726_v28 = vsel %vm74_vm0, %v5710_v52, 0.0 }
 0x807   :  { %v5735_v2 = vadd.f32 %v5734_v47, %v5733_v10  ;;  %v5727_v22 = vrot.slane %v5726_v28, 4 }
 0x809   :  { %v5736_v32 = vrot.slane %v5735_v2, 2  ;;  %v5728_v29 = vadd.f32 %v5727_v22, %v5726_v28 }
 0x80b   :  { %v5737_v37 = vadd.f32 %v5736_v32, %v5735_v2  ;;  %v5729_v23 = vrot.slane %v5728_v29, 2 }
 0x80d   :  { %v5738_v35 = vrot.slane %v5737_v37, 1  ;;  %v5730_v43 = vadd.f32 %v5729_v23, %v5728_v29 }
 0x80f   :  { %v5739_v12 = vadd.f32 %v5738_v35, %v5737_v37  ;;  %v5731_v14 = vrot.slane %v5730_v43, 1 }
 0x810   :  { %v6751_v7 = vpop.eup %6750 }
 0x811   :  { %v5775_v25 = vmul.f32 %v6751_v7, %v8056_v5  ;;  %v5743_v15 = vmul.f32 0.14285715, %v5739_v12  ;;  %v5732_v17 = vadd.f32 %v5731_v14, %v5730_v43 }
 0x812   :  { %v6753_v51 = vpop.eup %6752 }
 0x813   :  { %v5788_v4 = vmul.f32 %v8083_v38, %v5775_v25  ;;  %v5773_v50 = vmul.f32 %v6753_v51, %v8060_v58  ;;  %6754 = vrsqrt.f32 %v5743_v15  ;;  %v5742_v42 = vmul.f32 0.14285715, %v5732_v17 }
 0x814   :  { %vm5767_vm3 = vcmp.eq.f32.partialorder %v5743_v15, inf  ;;  %v5770_v41 = vand.u32 2147483648, %v5743_v15  ;;  %vm5769_vm4 = vcmp.eq.f32.partialorder %v5743_v15, 0.0 }
 0x815   :  { %v5799_v13 = vadd.f32 %v8089_v0, %v5788_v4  ;;  %v5787_v55 = vmul.f32 %v8083_v38, %v5773_v50  ;;  %6756 = vrsqrt.f32 %v5742_v42  ;;  %vm5760_vm5 = vcmp.eq.f32.partialorder %v5742_v42, inf }
 0x816   :  { %v5763_v53 = vand.u32 2147483648, %v5742_v42  ;;  %vm5762_vm6 = vcmp.eq.f32.partialorder %v5742_v42, 0.0 }
 0x817   :  { %v5858_v5 = vrot.slane %v5799_v13, %v7020_v39  ;;  %v5798_v56 = vadd.f32 %v8089_v0, %v5787_v55  ;;  %v5851_v61 = vcombine.high %v5799_v13, %v6792_v27 }
 0x819   :  { %v8099_v48 = vrot.slane %v5858_v5, %v7045_v57  ;;  %v5809_v44 = vrot.slane %v5798_v56, %v7020_v39  ;;  %v5802_v58 = vcombine.high %v5798_v56, %v6792_v27  ;;  %v5866_v8 = vcombine.high %v5858_v5, %v6792_v27 }
 0x81a   :  { %v5865_v46 = vrot.slane %v5851_v61, %v7020_v39 }
 0x81b   :  { %v5896_v59 = vcombine.high %v8099_v48, %v6792_v27  ;;  %v8106_v11 = vrot.slane %v5809_v44, %v7045_v57  ;;  %v5817_v36 = vcombine.high %v5809_v44, %v6792_v27  ;;  %v5816_v49 = vrot.slane %v5802_v58, %v7020_v39 }
 0x81c   :  { %v5880_v24 = vrot.slane %v5866_v8, %v7045_v57  ;;  %v8118_v26 = vrot.slane %v5865_v46, %v7045_v57  ;;  %v5881_v63 = vcombine.high %v5865_v46, %v6792_v27 }
 0x81d   :  { %6004 = vrot.lane.b32.xlu0 %v5896_v59, %s6801_s13  ;;  %v5847_v9 = vcombine.high %v8106_v11, %v6792_v27  ;;  %v5831_v20 = vrot.slane %v5817_v36, %v7045_v57  ;;  %v8123_v16 = vrot.slane %v5816_v49, %v7045_v57  ;;  %v5832_v40 = vcombine.high %v5816_v49, %v6792_v27 }
 0x81e   :  { %v5898_v21 = vcombine.high %v8118_v26, %v6792_v27  ;;  %v5895_v31 = vrot.slane %v5881_v63, %v7045_v57  ;;  %v5897_v47 = vcombine.high %v5880_v24, %v6792_v27 }
 0x81f   :  { %6002 = vrot.lane.b32.xlu1 %v5847_v9, %s6801_s13  ;;  %v5849_v1 = vcombine.high %v8123_v16, %v6792_v27  ;;  %v5846_v10 = vrot.slane %v5832_v40, %v7045_v57  ;;  %v5848_v52 = vcombine.high %v5831_v20, %v6792_v27 }
 0x820   :  { %v6755_v3 = vpop.eup %6754  ;;  %v5899_v2 = vcombine.high %v5895_v31, %v6792_v27 }
 0x821   :  { %v5766_v18 = vmul.f32 %v6755_v3, %v5743_v15  ;;  %6020 = vrot.lane.b32.xlu0 %v5880_v24, %s6794_s23  ;;  %v5850_v28 = vcombine.high %v5846_v10, %v6792_v27 }
 0x822   :  { %v6757_v45 = vpop.eup %6756 }
 0x823   :  { %v5768_v33 = vsel %vm5767_vm3, %v5743_v15, %v5766_v18  ;;  %6018 = vrot.lane.b32.xlu1 %v5831_v20, %s6794_s23  ;;  %v5759_v6 = vmul.f32 %v6757_v45, %v5742_v42  ;;  %v6802_v45 = vmov 1966171168  }
 0x824   :  { %v5771_v19 = vsel %vm5769_vm4, %v5770_v41, %v5768_v33  ;;  %v6129_v33 = vunpack.c.l.s4 %v6802_v45 }
 0x825   :  { %6758 = vrcp.f32 %v5771_v19  ;;  %6052 = vrot.lane.b32.xlu0 %v5898_v21, %s6801_s13  ;;  %v5761_v54 = vsel %vm5760_vm5, %v5742_v42, %v5759_v6 }
 0x826   :  { %v5764_v62 = vsel %vm5762_vm6, %v5763_v53, %v5761_v54  ;;  %v6130_v19 = vunpack.c.0.s8 %v6129_v33 }
 0x827   :  { %6050 = vrot.lane.b32.xlu1 %v5849_v1, %s6801_s13  ;;  %6760 = vrcp.f32 %v5764_v62 }
 0x828   :  { %v6133_v54 = vsub.s32 %v6130_v19, %v7015_v34 }
 0x829   :  { %6068 = vrot.lane.b32.xlu0 %v5895_v31, %s6794_s23 }
 0x82b   :  { %6066 = vrot.lane.b32.xlu1 %v5846_v10, %s6794_s23 }
 0x82d   :  { %6036 = vrot.lane.b32.xlu0 %v5897_v47, %s6791_s4 }
 0x82f   :  { %6034 = vrot.lane.b32.xlu1 %v5848_v52, %s6791_s4 }
 0x831   :  { %6084 = vrot.lane.b32.xlu0 %v5899_v2, %s6791_s4 }
 0x832   :  { %v6759_v22 = vpop.eup %6758 }
 0x833   :  { %v5779_v32 = vmul.f32 %v6759_v22, %v8070_v60  ;;  %6082 = vrot.lane.b32.xlu1 %v5850_v28, %s6791_s4 }
 0x834   :  { %v6761_v29 = vpop.eup %6760 }
 0x835   :  { %v5790_v37 = vmul.f32 %v8083_v38, %v5779_v32  ;;  %v5777_v23 = vmul.f32 %v6761_v29, %v8074_v30 }
 0x837   :  { %v5801_v35 = vadd.f32 %v8089_v0, %v5790_v37  ;;  %v5789_v43 = vmul.f32 %v8083_v38, %v5777_v23 }
 0x839   :  { %v5949_v7 = vcombine.high %v5801_v35, %v6792_v27  ;;  %v5956_v12 = vrot.slane %v5801_v35, %v7020_v39  ;;  %v5800_v25 = vadd.f32 %v8089_v0, %v5789_v43 }
 0x83b   :  { %v8155_v14 = vrot.slane %v5956_v12, %v7045_v57  ;;  %v5900_v60 = vcombine.high %v5800_v25, %v6792_v27  ;;  %v5907_v15 = vrot.slane %v5800_v25, %v7020_v39  ;;  %v5964_v51 = vcombine.high %v5956_v12, %v6792_v27 }
 0x83c   :  { %v5963_v38 = vrot.slane %v5949_v7, %v7020_v39 }
 0x83d   :  { %v5994_v30 = vcombine.high %v8155_v14, %v6792_v27  ;;  %v8164_v4 = vrot.slane %v5907_v15, %v7045_v57  ;;  %v5915_v17 = vcombine.high %v5907_v15, %v6792_v27  ;;  %v5914_v50 = vrot.slane %v5900_v60, %v7020_v39 }
 0x83e   :  { %v5978_v42 = vrot.slane %v5964_v51, %v7045_v57  ;;  %v8173_v13 = vrot.slane %v5963_v38, %v7045_v57  ;;  %v5979_v61 = vcombine.high %v5963_v38, %v6792_v27 }
 0x83f   :  { %6008 = vrot.lane.b32.xlu0 %v5994_v30, %s6801_s13  ;;  %v5945_v0 = vcombine.high %v8164_v4, %v6792_v27  ;;  %v5929_v55 = vrot.slane %v5915_v17, %v7045_v57  ;;  %v8179_v5 = vrot.slane %v5914_v50, %v7045_v57  ;;  %v5930_v44 = vcombine.high %v5914_v50, %v6792_v27 }
 0x840   :  { %v5996_v56 = vcombine.high %v8173_v13, %v6792_v27  ;;  %v5993_v58 = vrot.slane %v5979_v61, %v7045_v57  ;;  %v5995_v8 = vcombine.high %v5978_v42, %v6792_v27 }
 0x841   :  { %6006 = vrot.lane.b32.xlu1 %v5945_v0, %s6801_s13  ;;  %v5947_v39 = vcombine.high %v8179_v5, %v6792_v27  ;;  %v5944_v59 = vrot.slane %v5930_v44, %v7045_v57  ;;  %v5946_v46 = vcombine.high %v5929_v55, %v6792_v27 }
 0x842   :  { %v5997_v9 = vcombine.high %v5993_v58, %v6792_v27 }
 0x843   :  { %6024 = vrot.lane.b32.xlu0 %v5978_v42, %s6794_s23  ;;  %v5948_v36 = vcombine.high %v5944_v59, %v6792_v27 }
 0x845   :  { %6022 = vrot.lane.b32.xlu1 %v5929_v55, %s6794_s23 }
 0x847   :  { %6056 = vrot.lane.b32.xlu0 %v5996_v56, %s6801_s13 }
 0x849   :  { %6054 = vrot.lane.b32.xlu1 %v5947_v39, %s6801_s13 }
 0x84b   :  { %6072 = vrot.lane.b32.xlu0 %v5993_v58, %s6794_s23 }
 0x84d   :  { %6070 = vrot.lane.b32.xlu1 %v5944_v59, %s6794_s23 }
 0x84f   :  { %6040 = vrot.lane.b32.xlu0 %v5995_v8, %s6791_s4 }
 0x851   :  { %6038 = vrot.lane.b32.xlu1 %v5946_v46, %s6791_s4 }
 0x853   :  { %6088 = vrot.lane.b32.xlu0 %v5997_v9, %s6791_s4 }
 0x855   :  { %6086 = vrot.lane.b32.xlu1 %v5948_v36, %s6791_s4  ;;  %s6204_s4 = sshll.u32 %s6803_s14, 4  ;;  %s6205_s4 = int_to_ptr.vmem [resolvable:$true] %s6204_s4 }
 0x856   :  { %s6766_s23 = scalar_lea.vmem %s6205_s4, 128  ;;  %p6771_p1 = scmp.lt.s32.totalorder %s6205_s4, %s6205_s4 }
 0x857   :  { %p6767_p0 = scmp.ne.s32.totalorder %s6205_s4, %s6766_s23  ;;  %p6772_p2 = scmp.lt.s32.totalorder %s6766_s23, %s6766_s23 }
 0x859   :  { %p6773_p3 = por %p6772_p2, %p6771_p1 }
 0x85b   :  { %p6774_p4 = pnand %p6773_p3, %p6767_p0 }
 0x88f   :  { %v6005_v49 = vpop.permute.xlu0 %6004 }
 0x890   :  { %v6095_v53 = vsel %vm74_vm0, %v8099_v48, %v6005_v49 }
 0x891   :  { %v6003_v57 = vpop.permute.xlu1 %6002 }
 0x892   :  { %v6094_v31 = vsel %vm74_vm0, %v8106_v11, %v6003_v57  ;;  %v8271_v11 = vlaneseq }
 0x893   :  { %v6021_v24 = vpop.permute.xlu0 %6020 }
 0x894   :  { %v6099_v1 = vsel %vm5570_vm13, %v6095_v53, %v6021_v24  ;;  %vm8220_vm8 = vcmp.lt.s32.totalorder %v8271_v11, 256 }
 0x895   :  { %v6019_v3 = vpop.permute.xlu1 %6018 }
 0x896   :  { %v6098_v52 = vsel %vm5570_vm13, %v6094_v31, %v6019_v3 }
 0x897   :  { %v6053_v18 = vpop.permute.xlu0 %6052 }
 0x898   :  { %v6108_v27 = vsel %vm74_vm0, %v8118_v26, %v6053_v18 }
 0x899   :  { %v6051_v20 = vpop.permute.xlu1 %6050 }
 0x89a   :  { %v6107_v10 = vsel %vm74_vm0, %v8123_v16, %v6051_v20 }
 0x89b   :  { %v6069_v41 = vpop.permute.xlu0 %6068 }
 0x89c   :  { %v6112_v40 = vsel %vm5570_vm13, %v6108_v27, %v6069_v41 }
 0x89d   :  { %v6067_v21 = vpop.permute.xlu1 %6066 }
 0x89e   :  { %v6111_v26 = vsel %vm5570_vm13, %v6107_v10, %v6067_v21 }
 0x89f   :  { %v6037_v63 = vpop.permute.xlu0 %6036 }
 0x8a0   :  { %v6104_v47 = vsel %vm6102_vm7, %v6099_v1, %v6037_v63 }
 0x8a1   :  { %v6035_v6 = vpop.permute.xlu1 %6034 }
 0x8a2   :  { %v6103_v22 = vsel %vm6102_vm7, %v6098_v52, %v6035_v6 }
 0x8a3   :  { %v6085_v62 = vpop.permute.xlu0 %6084 }
 0x8a4   :  { %v6116_v48 = vsel %vm6102_vm7, %v6112_v40, %v6085_v62 }
 0x8a5   :  { %v6142_v2 = vcombine.low %v6104_v47, %v6116_v48  ;;  %v6083_v28 = vpop.permute.xlu1 %6082 }
 0x8a6   :  { %v6115_v34 = vsel %vm6102_vm7, %v6111_v26, %v6083_v28 }
 0x8a7   :  { %v6149_v32 = vrot.slane %v6142_v2, %v6133_v54  ;;  %v6127_v29 = vcombine.low %v6103_v22, %v6115_v34 }
 0x8a9   :  { %v6156_v16 = vrot.slane %v6149_v32, %v6133_v54  ;;  %v6134_v23 = vrot.slane %v6127_v29, %v6133_v54 }
 0x8ab   :  { %6196 = vst.msk [vmem:[#allocation2 + $0x2] sm:$0x3] %vm8220_vm8, %v6156_v16  ;;  %v6141_v35 = vrot.slane %v6134_v23, %v6133_v54 }
 0x8ad   :  { %6195 = vst.msk [vmem:[#allocation2] sm:$0x3] %vm8220_vm8, %v6141_v35 }
 0x8b1   :  { %v6009_v43 = vpop.permute.xlu0 %6008 }
 0x8b2   :  { %v6097_v0 = vsel %vm74_vm0, %v8155_v14, %v6009_v43 }
 0x8b3   :  { %v6007_v7 = vpop.permute.xlu1 %6006 }
 0x8b4   :  { %v6096_v44 = vsel %vm74_vm0, %v8164_v4, %v6007_v7 }
 0x8b5   :  { %v6025_v12 = vpop.permute.xlu0 %6024 }
 0x8b6   :  { %v6101_v42 = vsel %vm5570_vm13, %v6097_v0, %v6025_v12 }
 0x8b7   :  { %v6023_v25 = vpop.permute.xlu1 %6022 }
 0x8b8   :  { %v6100_v59 = vsel %vm5570_vm13, %v6096_v44, %v6023_v25 }
 0x8b9   :  { %v6057_v60 = vpop.permute.xlu0 %6056 }
 0x8ba   :  { %v6110_v17 = vsel %vm74_vm0, %v8173_v13, %v6057_v60 }
 0x8bb   :  { %v6055_v15 = vpop.permute.xlu1 %6054 }
 0x8bc   :  { %v6109_v58 = vsel %vm74_vm0, %v8179_v5, %v6055_v15 }
 0x8bd   :  { %v6073_v30 = vpop.permute.xlu0 %6072 }
 0x8be   :  { %v6114_v55 = vsel %vm5570_vm13, %v6110_v17, %v6073_v30 }
 0x8bf   :  { %v6071_v51 = vpop.permute.xlu1 %6070 }
 0x8c0   :  { %v6113_v13 = vsel %vm5570_vm13, %v6109_v58, %v6071_v51 }
 0x8c1   :  { %v6041_v38 = vpop.permute.xlu0 %6040 }
 0x8c2   :  { %v6106_v61 = vsel %vm6102_vm7, %v6101_v42, %v6041_v38 }
 0x8c3   :  { %v6039_v50 = vpop.permute.xlu1 %6038 }
 0x8c4   :  { %v6105_v46 = vsel %vm6102_vm7, %v6100_v59, %v6039_v50 }
 0x8c5   :  { %v6089_v56 = vpop.permute.xlu0 %6088 }
 0x8c6   :  { %v6118_v39 = vsel %vm6102_vm7, %v6114_v55, %v6089_v56 }
 0x8c7   :  { %v6172_v14 = vcombine.low %v6106_v61, %v6118_v39  ;;  %v6087_v8 = vpop.permute.xlu1 %6086 }
 0x8c8   :  { %v6117_v36 = vsel %vm6102_vm7, %v6113_v13, %v6087_v8 }
 0x8c9   :  { %v6179_v9 = vrot.slane %v6172_v14, %v6133_v54  ;;  %v6157_v49 = vcombine.low %v6105_v46, %v6117_v36 }
 0x8cb   :  { %v6186_v57 = vrot.slane %v6179_v9, %v6133_v54  ;;  %v6164_v24 = vrot.slane %v6157_v49, %v6133_v54 }
 0x8cd   :  { %6198 = vst.msk [vmem:[#allocation2 + $0x6] sm:$0x3] %vm8220_vm8, %v6186_v57  ;;  %v6171_v4 = vrot.slane %v6164_v24, %v6133_v54 }
 0x8cf   :  { %6197 = vst.msk [vmem:[#allocation2 + $0x4] sm:$0x3] %vm8220_vm8, %v6171_v4 }
 0x8d0   :  { %6777 = shalt.err (!%p6774_p4)
}
 0x8d1   :  { %s6804_s1 = smov 2  }
 0x8d2   :  { %6210 = dma.vmem_to_hbm [thread:$0]  %s6205_s4, 128, %s8268_s15, [#allocation3], %s6801_s13, %s6801_s13, %s6804_s1  }
 0x8d3   :  { %6786 = dma.done.wait [#allocation3], 128  }
 0x8d4   :  { %6787 = vsyncadd [#allocation3], 4294967168 }
 0x8d5   :  { %6214 = vsyncpa [#allocation3], 1 }

</bundles_post_ra>
